<compile_context>
chip_gen: v6e
topology: v6e:2x2x1
jax: 0.10.0
libtpu: 0.0.40
codegen_flags: <defaults>
</compile_context>

<pallas_src>
import functools

import jax
import jax.numpy as jnp
from jax.experimental import pallas as pl
from jax.experimental.pallas import tpu as pltpu

F_LANE = 128                        # lane-dense feature padding
MAX_TILE = 1024                     # row / reduction tile cap (review: 256 -> 1024)
VMEM_LIMIT = 32 * 1024 * 1024       # scoped VMEM limit, safe on v5e/v6e/v7x


def _round_up(x, m):
    return ((x + m - 1) // m) * m


def _pad_nodes(n):
    """Pad node count so the chosen tiles divide it exactly."""
    if n <= MAX_TILE:
        return max(F_LANE, _round_up(n, F_LANE))
    return _round_up(n, MAX_TILE)


def _pad2d(x, rows, cols):
    return jnp.pad(x, ((0, rows - x.shape[0]), (0, cols - x.shape[1])))


# ---------------------------------------------------------------------------
# Kernel 1: per-layer feature transform.  Reads a row tile of the hidden-state
# slab [n_pad, P*f_in] and writes the XW slab [n_pad, P*f_out]; both passes
# are emitted per grid step so stores are P*128 lanes wide and the weight tile
# stays resident.
# ---------------------------------------------------------------------------
def _xw_kernel(h_ref, w_ref, o_ref, *, n_pass, f_in, f_out):
    for pp in range(n_pass):                      # static unroll (n_pass = 1 or 2)
        h = h_ref[:, pp * f_in:(pp + 1) * f_in]
        o_ref[:, pp * f_out:(pp + 1) * f_out] = jnp.dot(
            h, w_ref[...], preferred_element_type=jnp.float32
        ).astype(o_ref.dtype)


def _xw_matmul(h_slab, w, n_pass, tm):
    n_pad = h_slab.shape[0]
    f_in, f_out = w.shape
    flops = 2 * n_pass * n_pad * f_in * f_out
    bytes_accessed = (h_slab.size + w.size + n_pass * n_pad * f_out) * 2
    kernel = functools.partial(_xw_kernel, n_pass=n_pass, f_in=f_in, f_out=f_out)
    return pl.pallas_call(
        kernel,
        out_shape=jax.ShapeDtypeStruct((n_pad, n_pass * f_out), jnp.bfloat16),
        grid=(n_pad // tm,),
        in_specs=[
            pl.BlockSpec((tm, n_pass * f_in), lambda i: (i, 0)),   # H slab row tile
            pl.BlockSpec((f_in, f_out), lambda i: (0, 0)),         # W (resident)
        ],
        out_specs=pl.BlockSpec((tm, n_pass * f_out), lambda i: (i, 0)),
        compiler_params=pltpu.CompilerParams(
            dimension_semantics=("parallel",),
            vmem_limit_bytes=VMEM_LIMIT),
        cost_estimate=pl.CostEstimate(
            flops=flops, transcendentals=0, bytes_accessed=bytes_accessed),
    )(h_slab, w)


# ---------------------------------------------------------------------------
# Kernel 2: tiled aggregation  H_out = PReLU(A_hat @ XW + b).
# Reduction axis last; f32 accumulator in VMEM scratch; bias + PReLU fused
# into the epilogue under pl.when(k == last).  When the XW slab fits VMEM it
# is kept fully resident (constant index_map) and sliced per reduction step,
# so only A_hat is streamed from HBM.
# ---------------------------------------------------------------------------
def _agg_kernel(a_ref, xw_ref, b_ref, alpha_ref, o_ref, acc_ref,
                *, apply_act, xw_resident, tk):
    k = pl.program_id(1)

    @pl.when(k == 0)
    def _():
        acc_ref[...] = jnp.zeros_like(acc_ref)

    if xw_resident:
        start = pl.multiple_of(k * tk, F_LANE)
        xw = xw_ref[pl.ds(start, tk), :]
    else:
        xw = xw_ref[...]
    acc_ref[...] += jnp.dot(a_ref[...], xw, preferred_element_type=jnp.float32)

    @pl.when(k == pl.num_programs(1) - 1)
    def _():
        h = acc_ref[...] + b_ref[...]
        if apply_act:
            # Per-channel PReLU (GGD passes nn.PReLU(n_hidden) as activation).
            h = jnp.maximum(h, 0.0) + alpha_ref[...] * jnp.minimum(h, 0.0)
        o_ref[...] = h.astype(o_ref.dtype)


def _aggregate(a_bf16, xw, b_row, alpha_row, tm, tk, apply_act, out_dtype):
    n_pad = a_bf16.shape[0]
    f_tot = xw.shape[1]
    n_row_tiles = n_pad // tm
    n_k_tiles = n_pad // tk

    # Decide whether the whole XW slab can live in VMEM alongside the other
    # buffers (conservative double-buffered estimate, 75% of the scoped limit).
    out_itemsize = jnp.dtype(out_dtype).itemsize
    a_tile_bytes = tm * tk * 2 * 2
    acc_bytes = tm * f_tot * 4
    out_bytes = tm * f_tot * out_itemsize * 2
    xw_bytes = xw.size * 2
    xw_resident = (2 * xw_bytes + a_tile_bytes + acc_bytes + out_bytes
                   <= int(VMEM_LIMIT * 0.75))
    if xw_resident:
        xw_spec = pl.BlockSpec((n_pad, f_tot), lambda i, k: (0, 0))
        xw_stream_bytes = xw_bytes
    else:
        xw_spec = pl.BlockSpec((tk, f_tot), lambda i, k: (k, 0))
        xw_stream_bytes = xw_bytes * n_row_tiles

    flops = 2 * n_pad * n_pad * f_tot
    bytes_accessed = (a_bf16.size * 2 + xw_stream_bytes
                      + n_pad * f_tot * out_itemsize)
    kernel = functools.partial(_agg_kernel, apply_act=apply_act,
                               xw_resident=xw_resident, tk=tk)
    # TODO(synk): block-sparse skipping of all-zero A_hat tiles via
    # PrefetchScalarGridSpec (scalar-prefetched block indices) is the big win
    # for real (sparse) graphs; dense streaming kept here.
    return pl.pallas_call(
        kernel,
        out_shape=jax.ShapeDtypeStruct((n_pad, f_tot), out_dtype),
        grid=(n_row_tiles, n_k_tiles),
        in_specs=[
            pl.BlockSpec((tm, tk), lambda i, k: (i, k)),       # A_hat tile
            xw_spec,                                           # XW (resident or tiled)
            pl.BlockSpec((1, f_tot), lambda i, k: (0, 0)),     # bias
            pl.BlockSpec((1, f_tot), lambda i, k: (0, 0)),     # PReLU alpha
        ],
        out_specs=pl.BlockSpec((tm, f_tot), lambda i, k: (i, 0)),
        scratch_shapes=[pltpu.VMEM((tm, f_tot), jnp.float32)],
        compiler_params=pltpu.CompilerParams(
            dimension_semantics=("parallel", "arbitrary"),
            vmem_limit_bytes=VMEM_LIMIT),
        cost_estimate=pl.CostEstimate(
            flops=flops, transcendentals=0, bytes_accessed=bytes_accessed),
    )(a_bf16, xw, b_row, alpha_row)


# ---------------------------------------------------------------------------
# Forward pass wrappers
# ---------------------------------------------------------------------------
@jax.jit
def encoder_forward_passes(a_hat, feats_stack, params):
    """Run P feature passes (clean / corrupted) through the GCN stack.

    a_hat:       dense normalized adjacency [N, N] (shared by all layers).
    feats_stack: [P, N, in_feats] node features (pass axis first).
    params:      list of (W, b, alpha) per GCN layer.
    Returns [P, N, n_hidden] float32.
    """
    p, n, f_in0 = feats_stack.shape
    n_hidden = params[-1][0].shape[1]
    n_pad = _pad_nodes(n)
    tm = min(MAX_TILE, n_pad)
    tk = min(MAX_TILE, n_pad)
    f_pad = _round_up(n_hidden, F_LANE)

    # Single padded bf16 adjacency shared across all layers.
    # TODO(synk): int8 (v5e/v6e) / fp8 (v7x) A_hat compression would halve the
    # dominant HBM stream; kept bf16 for generation-agnostic correctness.
    a_bf16 = _pad2d(a_hat.astype(jnp.float32), n_pad, n_pad).astype(jnp.bfloat16)

    # Layer-0 hidden state as one lane-dense slab [n_pad, P*f_in_pad].
    f_in_pad0 = _round_up(f_in0, F_LANE)
    h_slab = jnp.concatenate(
        [_pad2d(feats_stack[pp], n_pad, f_in_pad0) for pp in range(p)],
        axis=1).astype(jnp.bfloat16)

    n_layers = len(params)
    out_f32 = None
    for li, (w, b, alpha) in enumerate(params):
        f_in = w.shape[0]
        f_in_pad = _round_up(f_in, F_LANE)
        w_p = _pad2d(w.astype(jnp.float32), f_in_pad, f_pad).astype(jnp.bfloat16)
        b_row = jnp.tile(
            _pad2d(b.astype(jnp.float32).reshape(1, -1), 1, f_pad), (1, p))
        alpha_row = jnp.tile(
            _pad2d(alpha.astype(jnp.float32).reshape(1, -1), 1, f_pad), (1, p))

        xw = _xw_matmul(h_slab, w_p, p, tm)               # [n_pad, P*f_pad] bf16
        is_last = li == n_layers - 1
        # GGD's GCN applies the activation inside every GraphConv layer.
        out = _aggregate(a_bf16, xw, b_row, alpha_row, tm, tk,
                         apply_act=True,
                         out_dtype=jnp.float32 if is_last else jnp.bfloat16)
        if is_last:
            out_f32 = out
        else:
            h_slab = out        # stays in bf16 slab layout: no transpose / cast

    out_f32 = jnp.transpose(out_f32.reshape(n_pad, p, f_pad), (1, 0, 2))
    return out_f32[:, :n, :n_hidden]


def encoder_forward(a_hat, feats, params, corrupt=False, perm_key=None):
    """Equivalent of Encoder.forward(blocks, corrupt) with gnn_encoder='gcn'."""
    h = feats
    if corrupt:
        # torch.randperm(num_src_nodes) row shuffle of the node features.
        perm = jax.random.permutation(perm_key, h.shape[0])
        h = h[perm]
    return encoder_forward_passes(a_hat, h[None], params)[0]


def encoder_forward_both(a_hat, feats, params, perm_key):
    """Fused clean + corrupted pass: shares the dominant A_hat HBM stream."""
    perm = jax.random.permutation(perm_key, feats.shape[0])
    stack = jnp.stack([feats, feats[perm]], axis=0)
    out = encoder_forward_passes(a_hat, stack, params)
    return out[0], out[1]


# ---------------------------------------------------------------------------
# Reference, init helpers and demo
# ---------------------------------------------------------------------------
def _normalize_adj(adj):
    """Symmetric 'both' normalization with self-loops: D^{-1/2}(A+I)D^{-1/2}."""
    n = adj.shape[0]
    a = adj + jnp.eye(n, dtype=adj.dtype)
    deg = jnp.sum(a, axis=1)
    d_inv_sqrt = 1.0 / jnp.sqrt(jnp.maximum(deg, 1e-12))
    return a * d_inv_sqrt[:, None] * d_inv_sqrt[None, :]


def _glorot(key, shape):
    fan_in, fan_out = shape
    limit = (6.0 / (fan_in + fan_out)) ** 0.5
    return jax.random.uniform(key, shape, jnp.float32, -limit, limit)


def _reference_forward(a, feats, params):
    h = feats
    for (w, b, alpha) in params:
        z = a @ (h @ w) + b
        h = jnp.maximum(z, 0.0) + alpha * jnp.minimum(z, 0.0)
    return h


if __name__ == "__main__":
    N = 64          # number of nodes
    IN_FEATS = 32   # in_feats
    N_HIDDEN = 32   # n_hidden
    N_LAYERS = 2    # n_layers

    key = jax.random.PRNGKey(0)
    k_adj, k_feat, k_perm, k_params = jax.random.split(key, 4)

    # Deterministic random graph -> dense normalized adjacency (all layers).
    adj_raw = (jax.random.uniform(k_adj, (N, N)) < 0.1).astype(jnp.float32)
    adj_sym = jnp.maximum(adj_raw, adj_raw.T)
    a_hat = _normalize_adj(adj_sym)

    feats = jax.random.normal(k_feat, (N, IN_FEATS), jnp.float32)

    params = []
    dims = [IN_FEATS] + [N_HIDDEN] * N_LAYERS
    layer_keys = jax.random.split(k_params, N_LAYERS)
    for l in range(N_LAYERS):
        w = _glorot(layer_keys[l], (dims[l], dims[l + 1]))
        b = jnp.zeros((1, dims[l + 1]), jnp.float32)
        alpha = jnp.full((1, dims[l + 1]), 0.25, jnp.float32)
        params.append((w, b, alpha))

    # Fused clean + corrupted pass (single A_hat stream per layer).
    out_pos, out_neg = encoder_forward_both(a_hat, feats, params, k_perm)
    jax.block_until_ready(out_pos)
    jax.block_until_ready(out_neg)
    assert out_pos.shape == (N, N_HIDDEN)
    assert out_neg.shape == (N, N_HIDDEN)

    # Original Encoder.forward(blocks, corrupt) API (single-pass path).
    out_single = encoder_forward(a_hat, feats, params, corrupt=False)
    out_corrupt = encoder_forward(a_hat, feats, params, corrupt=True,
                                  perm_key=k_perm)
    jax.block_until_ready(out_single)
    jax.block_until_ready(out_corrupt)
    assert out_single.shape == (N, N_HIDDEN)
    assert out_corrupt.shape == (N, N_HIDDEN)

    # Validate against a pure-JAX f32 reference (bf16 MXU inputs -> tolerance).
    perm = jax.random.permutation(k_perm, N)
    ref_pos = _reference_forward(a_hat, feats, params)
    ref_neg = _reference_forward(a_hat, feats[perm], params)
    err = max(float(jnp.max(jnp.abs(out_pos - ref_pos))),
              float(jnp.max(jnp.abs(out_neg - ref_neg))))
    assert err < 0.15, f"max abs error vs f32 reference too large: {err}"

    # Fused and single-pass paths agree (identical bf16 math).
    err2 = float(jnp.max(jnp.abs(out_single - out_pos)))
    assert err2 < 1e-3, f"fused vs single-pass mismatch: {err2}"

    print("KERNEL_OK")
</pallas_src>

<mosaic_0001>
module attributes {stable_mosaic.version = 11 : i64} {
  func.func @_xw_kernel(%arg0: i32, %arg1: memref<128x256xbf16, #tpu.memory_space<vmem>>, %arg2: memref<128x128xbf16, #tpu.memory_space<vmem>>, %arg3: memref<128x256xbf16, #tpu.memory_space<vmem>>) attributes {dimension_semantics = [#tpu.dimension_semantics<parallel>], iteration_bounds = array<i64: 1>, scalar_prefetch = 0 : i64, scratch_operands = 0 : i64, tpu.core_type = #tpu.core_type<tc>, window_params = [{transform_indices = @transform_0, window_bounds = array<i64: 128, 256>}, {pipeline_mode = #tpu.pipeline_mode<synchronous>, transform_indices = @transform_1, window_bounds = array<i64: 128, 128>}, {transform_indices = @transform_2, window_bounds = array<i64: 128, 256>}]} {
    %c0 = arith.constant 0 : index
    %c0_0 = arith.constant 0 : index
    %0 = vector.load %arg1[%c0, %c0_0] : memref<128x256xbf16, #tpu.memory_space<vmem>>, vector<128x128xbf16>
    %c0_1 = arith.constant 0 : index
    %c0_2 = arith.constant 0 : index
    %1 = vector.load %arg2[%c0_1, %c0_2] : memref<128x128xbf16, #tpu.memory_space<vmem>>, vector<128x128xbf16>
    %cst = arith.constant dense<0.000000e+00> : vector<128x128xf32>
    %2 = tpu.matmul %0, %1, %cst {dimension_numbers = #tpu.dot_dimension_numbers<[1], [0], [0], [1], [0, 0, 1, 1], [], []>} : vector<128x128xbf16>, vector<128x128xbf16>, vector<128x128xf32> -> vector<128x128xf32>
    %3 = arith.truncf %2 : vector<128x128xf32> to vector<128x128xbf16>
    %c0_3 = arith.constant 0 : index
    %c0_4 = arith.constant 0 : index
    %4 = vector.load %arg3[%c0_3, %c0_4] : memref<128x256xbf16, #tpu.memory_space<vmem>>, vector<128x128xbf16>
    tpu.vector_store %arg3[%c0_3, %c0_4], %3 {strides = array<i32>} : memref<128x256xbf16, #tpu.memory_space<vmem>>, vector<128x128xbf16>,
    %c0_5 = arith.constant 0 : index
    %c128 = arith.constant 128 : index
    %5 = vector.load %arg1[%c0_5, %c128] : memref<128x256xbf16, #tpu.memory_space<vmem>>, vector<128x128xbf16>
    %c0_6 = arith.constant 0 : index
    %c0_7 = arith.constant 0 : index
    %6 = vector.load %arg2[%c0_6, %c0_7] : memref<128x128xbf16, #tpu.memory_space<vmem>>, vector<128x128xbf16>
    %cst_8 = arith.constant dense<0.000000e+00> : vector<128x128xf32>
    %7 = tpu.matmul %5, %6, %cst_8 {dimension_numbers = #tpu.dot_dimension_numbers<[1], [0], [0], [1], [0, 0, 1, 1], [], []>} : vector<128x128xbf16>, vector<128x128xbf16>, vector<128x128xf32> -> vector<128x128xf32>
    %8 = arith.truncf %7 : vector<128x128xf32> to vector<128x128xbf16>
    %c0_9 = arith.constant 0 : index
    %c128_10 = arith.constant 128 : index
    %9 = vector.load %arg3[%c0_9, %c128_10] : memref<128x256xbf16, #tpu.memory_space<vmem>>, vector<128x128xbf16>
    tpu.vector_store %arg3[%c0_9, %c128_10], %8 {strides = array<i32>} : memref<128x256xbf16, #tpu.memory_space<vmem>>, vector<128x128xbf16>,
    return
  }
  func.func @transform_0(%arg0: i32) -> (i32, i32) {
    %c0_i32 = arith.constant 0 : i32
    %c0_i32_0 = arith.constant 0 : i32
    return %arg0, %c0_i32 : i32, i32
  }
  func.func @transform_1(%arg0: i32) -> (i32, i32) {
    %c0_i32 = arith.constant 0 : i32
    %c0_i32_0 = arith.constant 0 : i32
    %c0_i32_1 = arith.constant 0 : i32
    return %c0_i32, %c0_i32_0 : i32, i32
  }
  func.func @transform_2(%arg0: i32) -> (i32, i32) {
    %c0_i32 = arith.constant 0 : i32
    %c0_i32_0 = arith.constant 0 : i32
    return %arg0, %c0_i32 : i32, i32
  }
}

module attributes {stable_mosaic.version = 11 : i64} {
  func.func @_agg_kernel(%arg0: i32, %arg1: i32, %arg2: memref<128x128xbf16, #tpu.memory_space<vmem>>, %arg3: memref<128x256xbf16, #tpu.memory_space<vmem>>, %arg4: memref<1x256xf32, #tpu.memory_space<vmem>>, %arg5: memref<1x256xf32, #tpu.memory_space<vmem>>, %arg6: memref<128x256xf32, #tpu.memory_space<vmem>>, %arg7: memref<128x256xf32, #tpu.memory_space<vmem>>) attributes {dimension_semantics = [#tpu.dimension_semantics<parallel>, #tpu.dimension_semantics<arbitrary>], iteration_bounds = array<i64: 1, 1>, scalar_prefetch = 0 : i64, scratch_operands = 1 : i64, tpu.core_type = #tpu.core_type<tc>, window_params = [{transform_indices = @transform_0, window_bounds = array<i64: 128, 128>}, {pipeline_mode = #tpu.pipeline_mode<synchronous>, transform_indices = @transform_1, window_bounds = array<i64: 128, 256>}, {pipeline_mode = #tpu.pipeline_mode<synchronous>, transform_indices = @transform_2, window_bounds = array<i64: 1, 256>}, {pipeline_mode = #tpu.pipeline_mode<synchronous>, transform_indices = @transform_3, window_bounds = array<i64: 1, 256>}, {transform_indices = @transform_4, window_bounds = array<i64: 128, 256>}]} {
    %c0_i32 = arith.constant 0 : i32
    %0 = arith.cmpi eq, %arg1, %c0_i32 : i32
    %1 = arith.extui %0 : i1 to i32
    %c0_i32_0 = arith.constant 0 : i32
    %2 = arith.cmpi ne, %1, %c0_i32_0 : i32
    scf.if %2 {
      %cst_9 = arith.constant 0.000000e+00 : f32
      %15 = vector.broadcast %cst_9 : f32 to vector<128x256xf32>
      %c0_10 = arith.constant 0 : index
      %c0_11 = arith.constant 0 : index
      %16 = vector.load %arg7[%c0_10, %c0_11] : memref<128x256xf32, #tpu.memory_space<vmem>>, vector<128x256xf32>
      tpu.vector_store %arg7[%c0_10, %c0_11], %15 {strides = array<i32>} : memref<128x256xf32, #tpu.memory_space<vmem>>, vector<128x256xf32>,
    } else {
    }
    %c128_i32 = arith.constant 128 : i32
    %3 = arith.muli %arg1, %c128_i32 : i32
    %4 = tpu.assume_multiple %3, 128 : i32
    %5 = arith.index_cast %4 : i32 to index
    %c0 = arith.constant 0 : index
    %6 = vector.load %arg3[%5, %c0] : memref<128x256xbf16, #tpu.memory_space<vmem>>, vector<128x256xbf16>
    %c0_1 = arith.constant 0 : index
    %c0_2 = arith.constant 0 : index
    %7 = vector.load %arg7[%c0_1, %c0_2] : memref<128x256xf32, #tpu.memory_space<vmem>>, vector<128x256xf32>
    %c0_3 = arith.constant 0 : index
    %c0_4 = arith.constant 0 : index
    %8 = vector.load %arg2[%c0_3, %c0_4] : memref<128x128xbf16, #tpu.memory_space<vmem>>, vector<128x128xbf16>
    %cst = arith.constant dense<0.000000e+00> : vector<128x256xf32>
    %9 = tpu.matmul %8, %6, %cst {dimension_numbers = #tpu.dot_dimension_numbers<[1], [0], [0], [1], [0, 0, 1, 1], [], []>} : vector<128x128xbf16>, vector<128x256xbf16>, vector<128x256xf32> -> vector<128x256xf32>
    %10 = arith.addf %7, %9 : vector<128x256xf32>
    %c0_5 = arith.constant 0 : index
    %c0_6 = arith.constant 0 : index
    %11 = vector.load %arg7[%c0_5, %c0_6] : memref<128x256xf32, #tpu.memory_space<vmem>>, vector<128x256xf32>
    tpu.vector_store %arg7[%c0_5, %c0_6], %10 {strides = array<i32>} : memref<128x256xf32, #tpu.memory_space<vmem>>, vector<128x256xf32>,
    %c0_i32_7 = arith.constant 0 : i32
    %12 = arith.cmpi eq, %arg1, %c0_i32_7 : i32
    %13 = arith.extui %12 : i1 to i32
    %c0_i32_8 = arith.constant 0 : i32
    %14 = arith.cmpi ne, %13, %c0_i32_8 : i32
    scf.if %14 {
      %c0_9 = arith.constant 0 : index
      %c0_10 = arith.constant 0 : index
      %15 = vector.load %arg7[%c0_9, %c0_10] : memref<128x256xf32, #tpu.memory_space<vmem>>, vector<128x256xf32>
      %c0_11 = arith.constant 0 : index
      %c0_12 = arith.constant 0 : index
      %16 = vector.load %arg4[%c0_11, %c0_12] : memref<1x256xf32, #tpu.memory_space<vmem>>, vector<1x256xf32>
      %17 = vector.broadcast %16 : vector<1x256xf32> to vector<128x256xf32>
      %18 = arith.addf %15, %17 : vector<128x256xf32>
      %cst_13 = arith.constant 0.000000e+00 : f32
      %19 = vector.broadcast %cst_13 : f32 to vector<128x256xf32>
      %20 = arith.maximumf %18, %19 : vector<128x256xf32>
      %c0_14 = arith.constant 0 : index
      %c0_15 = arith.constant 0 : index
      %21 = vector.load %arg5[%c0_14, %c0_15] : memref<1x256xf32, #tpu.memory_space<vmem>>, vector<1x256xf32>
      %cst_16 = arith.constant 0.000000e+00 : f32
      %22 = vector.broadcast %cst_16 : f32 to vector<128x256xf32>
      %23 = arith.minimumf %18, %22 : vector<128x256xf32>
      %24 = vector.broadcast %21 : vector<1x256xf32> to vector<128x256xf32>
      %25 = arith.mulf %24, %23 : vector<128x256xf32>
      %26 = arith.addf %20, %25 : vector<128x256xf32>
      %c0_17 = arith.constant 0 : index
      %c0_18 = arith.constant 0 : index
      %27 = vector.load %arg6[%c0_17, %c0_18] : memref<128x256xf32, #tpu.memory_space<vmem>>, vector<128x256xf32>
      tpu.vector_store %arg6[%c0_17, %c0_18], %26 {strides = array<i32>} : memref<128x256xf32, #tpu.memory_space<vmem>>, vector<128x256xf32>,
    } else {
    }
    return
  }
  func.func @transform_0(%arg0: i32, %arg1: i32) -> (i32, i32) {
    %c0_i32 = arith.constant 0 : i32
    return %arg0, %arg1 : i32, i32
  }
  func.func @transform_1(%arg0: i32, %arg1: i32) -> (i32, i32) {
    %c0_i32 = arith.constant 0 : i32
    %c0_i32_0 = arith.constant 0 : i32
    %c0_i32_1 = arith.constant 0 : i32
    return %c0_i32, %c0_i32_0 : i32, i32
  }
  func.func @transform_2(%arg0: i32, %arg1: i32) -> (i32, i32) {
    %c0_i32 = arith.constant 0 : i32
    %c0_i32_0 = arith.constant 0 : i32
    %c0_i32_1 = arith.constant 0 : i32
    return %c0_i32, %c0_i32_0 : i32, i32
  }
  func.func @transform_3(%arg0: i32, %arg1: i32) -> (i32, i32) {
    %c0_i32 = arith.constant 0 : i32
    %c0_i32_0 = arith.constant 0 : i32
    %c0_i32_1 = arith.constant 0 : i32
    return %c0_i32, %c0_i32_0 : i32, i32
  }
  func.func @transform_4(%arg0: i32, %arg1: i32) -> (i32, i32) {
    %c0_i32 = arith.constant 0 : i32
    %c0_i32_0 = arith.constant 0 : i32
    return %arg0, %c0_i32 : i32, i32
  }
}

module attributes {stable_mosaic.version = 11 : i64} {
  func.func @_agg_kernel(%arg0: i32, %arg1: i32, %arg2: memref<128x128xbf16, #tpu.memory_space<vmem>>, %arg3: memref<128x256xbf16, #tpu.memory_space<vmem>>, %arg4: memref<1x256xf32, #tpu.memory_space<vmem>>, %arg5: memref<1x256xf32, #tpu.memory_space<vmem>>, %arg6: memref<128x256xbf16, #tpu.memory_space<vmem>>, %arg7: memref<128x256xf32, #tpu.memory_space<vmem>>) attributes {dimension_semantics = [#tpu.dimension_semantics<parallel>, #tpu.dimension_semantics<arbitrary>], iteration_bounds = array<i64: 1, 1>, scalar_prefetch = 0 : i64, scratch_operands = 1 : i64, tpu.core_type = #tpu.core_type<tc>, window_params = [{transform_indices = @transform_0, window_bounds = array<i64: 128, 128>}, {pipeline_mode = #tpu.pipeline_mode<synchronous>, transform_indices = @transform_1, window_bounds = array<i64: 128, 256>}, {pipeline_mode = #tpu.pipeline_mode<synchronous>, transform_indices = @transform_2, window_bounds = array<i64: 1, 256>}, {pipeline_mode = #tpu.pipeline_mode<synchronous>, transform_indices = @transform_3, window_bounds = array<i64: 1, 256>}, {transform_indices = @transform_4, window_bounds = array<i64: 128, 256>}]} {
    %c0_i32 = arith.constant 0 : i32
    %0 = arith.cmpi eq, %arg1, %c0_i32 : i32
    %1 = arith.extui %0 : i1 to i32
    %c0_i32_0 = arith.constant 0 : i32
    %2 = arith.cmpi ne, %1, %c0_i32_0 : i32
    scf.if %2 {
      %cst_9 = arith.constant 0.000000e+00 : f32
      %15 = vector.broadcast %cst_9 : f32 to vector<128x256xf32>
      %c0_10 = arith.constant 0 : index
      %c0_11 = arith.constant 0 : index
      %16 = vector.load %arg7[%c0_10, %c0_11] : memref<128x256xf32, #tpu.memory_space<vmem>>, vector<128x256xf32>
      tpu.vector_store %arg7[%c0_10, %c0_11], %15 {strides = array<i32>} : memref<128x256xf32, #tpu.memory_space<vmem>>, vector<128x256xf32>,
    } else {
    }
    %c128_i32 = arith.constant 128 : i32
    %3 = arith.muli %arg1, %c128_i32 : i32
    %4 = tpu.assume_multiple %3, 128 : i32
    %5 = arith.index_cast %4 : i32 to index
    %c0 = arith.constant 0 : index
    %6 = vector.load %arg3[%5, %c0] : memref<128x256xbf16, #tpu.memory_space<vmem>>, vector<128x256xbf16>
    %c0_1 = arith.constant 0 : index
    %c0_2 = arith.constant 0 : index
    %7 = vector.load %arg7[%c0_1, %c0_2] : memref<128x256xf32, #tpu.memory_space<vmem>>, vector<128x256xf32>
    %c0_3 = arith.constant 0 : index
    %c0_4 = arith.constant 0 : index
    %8 = vector.load %arg2[%c0_3, %c0_4] : memref<128x128xbf16, #tpu.memory_space<vmem>>, vector<128x128xbf16>
    %cst = arith.constant dense<0.000000e+00> : vector<128x256xf32>
    %9 = tpu.matmul %8, %6, %cst {dimension_numbers = #tpu.dot_dimension_numbers<[1], [0], [0], [1], [0, 0, 1, 1], [], []>} : vector<128x128xbf16>, vector<128x256xbf16>, vector<128x256xf32> -> vector<128x256xf32>
    %10 = arith.addf %7, %9 : vector<128x256xf32>
    %c0_5 = arith.constant 0 : index
    %c0_6 = arith.constant 0 : index
    %11 = vector.load %arg7[%c0_5, %c0_6] : memref<128x256xf32, #tpu.memory_space<vmem>>, vector<128x256xf32>
    tpu.vector_store %arg7[%c0_5, %c0_6], %10 {strides = array<i32>} : memref<128x256xf32, #tpu.memory_space<vmem>>, vector<128x256xf32>,
    %c0_i32_7 = arith.constant 0 : i32
    %12 = arith.cmpi eq, %arg1, %c0_i32_7 : i32
    %13 = arith.extui %12 : i1 to i32
    %c0_i32_8 = arith.constant 0 : i32
    %14 = arith.cmpi ne, %13, %c0_i32_8 : i32
    scf.if %14 {
      %c0_9 = arith.constant 0 : index
      %c0_10 = arith.constant 0 : index
      %15 = vector.load %arg7[%c0_9, %c0_10] : memref<128x256xf32, #tpu.memory_space<vmem>>, vector<128x256xf32>
      %c0_11 = arith.constant 0 : index
      %c0_12 = arith.constant 0 : index
      %16 = vector.load %arg4[%c0_11, %c0_12] : memref<1x256xf32, #tpu.memory_space<vmem>>, vector<1x256xf32>
      %17 = vector.broadcast %16 : vector<1x256xf32> to vector<128x256xf32>
      %18 = arith.addf %15, %17 : vector<128x256xf32>
      %cst_13 = arith.constant 0.000000e+00 : f32
      %19 = vector.broadcast %cst_13 : f32 to vector<128x256xf32>
      %20 = arith.maximumf %18, %19 : vector<128x256xf32>
      %c0_14 = arith.constant 0 : index
      %c0_15 = arith.constant 0 : index
      %21 = vector.load %arg5[%c0_14, %c0_15] : memref<1x256xf32, #tpu.memory_space<vmem>>, vector<1x256xf32>
      %cst_16 = arith.constant 0.000000e+00 : f32
      %22 = vector.broadcast %cst_16 : f32 to vector<128x256xf32>
      %23 = arith.minimumf %18, %22 : vector<128x256xf32>
      %24 = vector.broadcast %21 : vector<1x256xf32> to vector<128x256xf32>
      %25 = arith.mulf %24, %23 : vector<128x256xf32>
      %26 = arith.addf %20, %25 : vector<128x256xf32>
      %27 = arith.truncf %26 : vector<128x256xf32> to vector<128x256xbf16>
      %c0_17 = arith.constant 0 : index
      %c0_18 = arith.constant 0 : index
      %28 = vector.load %arg6[%c0_17, %c0_18] : memref<128x256xbf16, #tpu.memory_space<vmem>>, vector<128x256xbf16>
      tpu.vector_store %arg6[%c0_17, %c0_18], %27 {strides = array<i32>} : memref<128x256xbf16, #tpu.memory_space<vmem>>, vector<128x256xbf16>,
    } else {
    }
    return
  }
  func.func @transform_0(%arg0: i32, %arg1: i32) -> (i32, i32) {
    %c0_i32 = arith.constant 0 : i32
    return %arg0, %arg1 : i32, i32
  }
  func.func @transform_1(%arg0: i32, %arg1: i32) -> (i32, i32) {
    %c0_i32 = arith.constant 0 : i32
    %c0_i32_0 = arith.constant 0 : i32
    %c0_i32_1 = arith.constant 0 : i32
    return %c0_i32, %c0_i32_0 : i32, i32
  }
  func.func @transform_2(%arg0: i32, %arg1: i32) -> (i32, i32) {
    %c0_i32 = arith.constant 0 : i32
    %c0_i32_0 = arith.constant 0 : i32
    %c0_i32_1 = arith.constant 0 : i32
    return %c0_i32, %c0_i32_0 : i32, i32
  }
  func.func @transform_3(%arg0: i32, %arg1: i32) -> (i32, i32) {
    %c0_i32 = arith.constant 0 : i32
    %c0_i32_0 = arith.constant 0 : i32
    %c0_i32_1 = arith.constant 0 : i32
    return %c0_i32, %c0_i32_0 : i32, i32
  }
  func.func @transform_4(%arg0: i32, %arg1: i32) -> (i32, i32) {
    %c0_i32 = arith.constant 0 : i32
    %c0_i32_0 = arith.constant 0 : i32
    return %arg0, %c0_i32 : i32, i32
  }
}

</mosaic_0001>

<bundles_post_ra>
// kernel: encoder_forward_passes.4
= control target key start
LH: loop header
LB: loop body
LE: loop exit
PB: predicated region body
PF: predicated region fallthrough
CT: control target
= control target key end

     0   :  { %s1057_s1 = inlined_call_operand.vmem [shape: bf16[128,128], index: 1, kind: input, shape index: {}]   ;;  %s1058_s0 = inlined_call_operand.vmem [shape: bf16[128,256], index: 0, kind: input, shape index: {}]   ;;  %s1059_s2 = inlined_call_operand.vmem [shape: bf16[128,256], index: 2, kind: output, shape index: {}]  }
   0x1   :  { %v818_v0 = vld [vmem:[%s1057_s1 + $0x38] sm:$0xff]   ;;  %v820_v2 = vld [vmem:[%s1057_s1 + $0x30] sm:$0xff]   ;;  %v822_v4 = vld [vmem:[%s1057_s1 + $0x28] sm:$0xff]  }
   0x2   :  { %v819_v1 = vld [vmem:[%s1057_s1 + $0x38] sm:$0xff]   ;;  %754 = vmatprep.subr.bf16.mxu0 %v818_v0  ;;  %v821_v3 = vld [vmem:[%s1057_s1 + $0x30] sm:$0xff]   ;;  %v823_v5 = vld [vmem:[%s1057_s1 + $0x28] sm:$0xff]  }
   0x3   :  { %786 = vmatprep.subr.bf16.mxu1 %v819_v1  ;;  %755 = vmatpush3.bf16.msra.mxu0 %v818_v0  ;;  %v824_v6 = vld [vmem:[%s1057_s1 + $0x20] sm:$0xff]   ;;  %v826_v8 = vld [vmem:[%s1057_s1 + $0x18] sm:$0xff]   ;;  %v828_v10 = vld [vmem:[%s1057_s1 + $0x10] sm:$0xff]  }
   0x4   :  { %787 = vmatpush3.bf16.msra.mxu1 %v819_v1  ;;  %756 = vmatprep.subr.bf16.mxu0 %v820_v2  ;;  %v825_v7 = vld [vmem:[%s1057_s1 + $0x20] sm:$0xff]   ;;  %v827_v9 = vld [vmem:[%s1057_s1 + $0x18] sm:$0xff]   ;;  %v829_v11 = vld [vmem:[%s1057_s1 + $0x10] sm:$0xff]  }
   0x5   :  { %788 = vmatprep.subr.bf16.mxu1 %v821_v3  ;;  %v834_v12 = vld [vmem:[%s1058_s0] ss:$8 sps:$4 sm:$0xff]   ;;  %v835_v13 = vld [vmem:[%s1058_s0 + $0x4] ss:$8 sps:$4 sm:$0xff]   ;;  %v836_v18 = vld [vmem:[%s1058_s0 + $0x10] ss:$8 sps:$4 sm:$0xff]  }
   0x6   :  { %770 = vmatprep.mubr.bf16.mxu0 %v834_v12  ;;  %802 = vmatprep.mubr.bf16.mxu1 %v835_v13  ;;  %v830_v14 = vld [vmem:[%s1057_s1 + $0x8] sm:$0xff]   ;;  %v832_v16 = vld [vmem:[%s1057_s1] sm:$0xff]   ;;  %v837_v19 = vld [vmem:[%s1058_s0 + $0x14] ss:$8 sps:$4 sm:$0xff]  }
   0x7   :  { %757 = vmatpush3.bf16.msra.mxu0 %v820_v2  ;;  %v831_v15 = vld [vmem:[%s1057_s1 + $0x8] sm:$0xff]   ;;  %v833_v17 = vld [vmem:[%s1057_s1] sm:$0xff]   ;;  %v840_v22 = vld [vmem:[%s1058_s0 + $0x30] ss:$8 sps:$4 sm:$0xff]  }
   0x8   :  { %789 = vmatpush3.bf16.msra.mxu1 %v821_v3  ;;  %758 = vmatprep.subr.bf16.mxu0 %v822_v4  ;;  %v838_v20 = vld [vmem:[%s1058_s0 + $0x20] ss:$8 sps:$4 sm:$0xff]   ;;  %v839_v21 = vld [vmem:[%s1058_s0 + $0x24] ss:$8 sps:$4 sm:$0xff]   ;;  %v841_v23 = vld [vmem:[%s1058_s0 + $0x34] ss:$8 sps:$4 sm:$0xff]  }
   0x9   :  { %790 = vmatprep.subr.bf16.mxu1 %v823_v5  ;;  %v842_v24 = vld [vmem:[%s1058_s0 + $0x40] ss:$8 sps:$4 sm:$0xff]   ;;  %v843_v25 = vld [vmem:[%s1058_s0 + $0x44] ss:$8 sps:$4 sm:$0xff]   ;;  %v844_v26 = vld [vmem:[%s1058_s0 + $0x50] ss:$8 sps:$4 sm:$0xff]  }
   0xa   :  { %v845_v27 = vld [vmem:[%s1058_s0 + $0x54] ss:$8 sps:$4 sm:$0xff]   ;;  %v846_v28 = vld [vmem:[%s1058_s0 + $0x60] ss:$8 sps:$4 sm:$0xff]   ;;  %v847_v29 = vld [vmem:[%s1058_s0 + $0x64] ss:$8 sps:$4 sm:$0xff]  }
   0xb   :  { %759 = vmatpush3.bf16.msra.mxu0 %v822_v4  ;;  %v848_v30 = vld [vmem:[%s1058_s0 + $0x70] ss:$8 sps:$4 sm:$0xff]   ;;  %v849_v31 = vld [vmem:[%s1058_s0 + $0x74] ss:$8 sps:$4 sm:$0xff]  }
   0xc   :  { %791 = vmatpush3.bf16.msra.mxu1 %v823_v5  ;;  %760 = vmatprep.subr.bf16.mxu0 %v824_v6 }
   0xd   :  { %792 = vmatprep.subr.bf16.mxu1 %v825_v7 }
   0xf   :  { %761 = vmatpush3.bf16.msra.mxu0 %v824_v6 }
  0x10   :  { %793 = vmatpush3.bf16.msra.mxu1 %v825_v7  ;;  %762 = vmatprep.subr.bf16.mxu0 %v826_v8 }
  0x11   :  { %794 = vmatprep.subr.bf16.mxu1 %v827_v9 }
  0x13   :  { %763 = vmatpush3.bf16.msra.mxu0 %v826_v8 }
  0x14   :  { %795 = vmatpush3.bf16.msra.mxu1 %v827_v9  ;;  %764 = vmatprep.subr.bf16.mxu0 %v828_v10 }
  0x15   :  { %796 = vmatprep.subr.bf16.mxu1 %v829_v11 }
  0x17   :  { %765 = vmatpush3.bf16.msra.mxu0 %v828_v10 }
  0x18   :  { %797 = vmatpush3.bf16.msra.mxu1 %v829_v11  ;;  %766 = vmatprep.subr.bf16.mxu0 %v830_v14 }
  0x19   :  { %798 = vmatprep.subr.bf16.mxu1 %v831_v15 }
  0x1b   :  { %767 = vmatpush3.bf16.msra.mxu0 %v830_v14 }
  0x1c   :  { %799 = vmatpush3.bf16.msra.mxu1 %v831_v15  ;;  %768 = vmatprep.subr.bf16.mxu0 %v832_v16 }
  0x1d   :  { %800 = vmatprep.subr.bf16.mxu1 %v833_v17 }
  0x1f   :  { %769 = vmatpush3.bf16.msra.mxu0 %v832_v16 }
  0x20   :  { %801 = vmatpush3.bf16.msra.mxu1 %v833_v17 }
  0x22   :  { %771 = vmatmul.mubr.bf16.vlgmr.msra.gmra.mxu0 %v836_v18 }
  0x23   :  { %803 = vmatmul.mubr.bf16.vlgmr.msra.gmra.mxu1 %v837_v19  ;;  %774 = vmatprep.mubr.bf16.mxu0 %v838_v20 }
  0x24   :  { %806 = vmatprep.mubr.bf16.mxu1 %v839_v21 }
  0x2a   :  { %775 = vmatmul.mubr.bf16.gmra.mxu0 %v840_v22 }
  0x2b   :  { %807 = vmatmul.mubr.bf16.gmra.mxu1 %v841_v23  ;;  %778 = vmatprep.mubr.bf16.mxu0 %v842_v24 }
  0x2c   :  { %810 = vmatprep.mubr.bf16.mxu1 %v843_v25 }
  0x32   :  { %779 = vmatmul.mubr.bf16.gmra.mxu0 %v844_v26 }
  0x33   :  { %811 = vmatmul.mubr.bf16.gmra.mxu1 %v845_v27  ;;  %782 = vmatprep.mubr.bf16.mxu0 %v846_v28 }
  0x34   :  { %814 = vmatprep.mubr.bf16.mxu1 %v847_v29 }
  0x3a   :  { %783 = vmatmul.mubr.bf16.gmra.mxu0 %v848_v30 }
  0x3b   :  { %815 = vmatmul.mubr.bf16.gmra.mxu1 %v849_v31 }
  0xe2   :  { %v772_v32 = vpop.f32.mrf.mxu0 }
  0xe3   :  { %v692_v33 = vpack.c.bf16 %v772_v32, %v772_v32  ;;  %v804_v34 = vpop.f32.mrf.mxu1 }
  0xe4   :  { %v708_v35 = vpack.c.bf16 %v804_v34, %v804_v34  ;;  %v174_v36 = vpop.f32.mrf.mxu0 }
  0xe5   :  { %303 = vst [vmem:[%s1059_s2 + $0x10] sm:$0xf] %v692_v33  ;;  %v690_v37 = vpack.c.bf16 %v174_v36, %v174_v36  ;;  %v479_v38 = vpop.f32.mrf.mxu1 }
  0xe6   :  { %608 = vst [vmem:[%s1059_s2 + $0x14] sm:$0xf] %v708_v35  ;;  %v706_v39 = vpack.c.bf16 %v479_v38, %v479_v38  ;;  %v773_v40 = vpop.f32.mrf.mxu0 }
  0xe7   :  { %301 = vst [vmem:[%s1059_s2] sm:$0xf] %v690_v37  ;;  %v693_v41 = vpack.c.bf16 %v773_v40, %v773_v40  ;;  %v805_v42 = vpop.f32.mrf.mxu1 }
  0xe8   :  { %606 = vst [vmem:[%s1059_s2 + $0x4] sm:$0xf] %v706_v39  ;;  %v709_v43 = vpack.c.bf16 %v805_v42, %v805_v42  ;;  %v177_v44 = vpop.f32.mrf.mxu0 }
  0xe9   :  { %304 = vst [vmem:[%s1059_s2 + $0x18] sm:$0xf] %v693_v41  ;;  %v691_v45 = vpack.c.bf16 %v177_v44, %v177_v44  ;;  %v482_v46 = vpop.f32.mrf.mxu1 }
  0xea   :  { %609 = vst [vmem:[%s1059_s2 + $0x1c] sm:$0xf] %v709_v43  ;;  %v707_v47 = vpack.c.bf16 %v482_v46, %v482_v46  ;;  %v776_v48 = vpop.f32.mrf.mxu0 }
  0xeb   :  { %302 = vst [vmem:[%s1059_s2 + $0x8] sm:$0xf] %v691_v45  ;;  %v696_v49 = vpack.c.bf16 %v776_v48, %v776_v48  ;;  %v808_v50 = vpop.f32.mrf.mxu1 }
  0xec   :  { %607 = vst [vmem:[%s1059_s2 + $0xc] sm:$0xf] %v707_v47  ;;  %v712_v51 = vpack.c.bf16 %v808_v50, %v808_v50  ;;  %v190_v52 = vpop.f32.mrf.mxu0 }
  0xed   :  { %307 = vst [vmem:[%s1059_s2 + $0x30] sm:$0xf] %v696_v49  ;;  %v694_v53 = vpack.c.bf16 %v190_v52, %v190_v52  ;;  %v495_v54 = vpop.f32.mrf.mxu1 }
  0xee   :  { %612 = vst [vmem:[%s1059_s2 + $0x34] sm:$0xf] %v712_v51  ;;  %v710_v55 = vpack.c.bf16 %v495_v54, %v495_v54  ;;  %v777_v56 = vpop.f32.mrf.mxu0 }
  0xef   :  { %305 = vst [vmem:[%s1059_s2 + $0x20] sm:$0xf] %v694_v53  ;;  %v697_v57 = vpack.c.bf16 %v777_v56, %v777_v56  ;;  %v809_v58 = vpop.f32.mrf.mxu1 }
  0xf0   :  { %610 = vst [vmem:[%s1059_s2 + $0x24] sm:$0xf] %v710_v55  ;;  %v713_v59 = vpack.c.bf16 %v809_v58, %v809_v58  ;;  %v193_v60 = vpop.f32.mrf.mxu0 }
  0xf1   :  { %308 = vst [vmem:[%s1059_s2 + $0x38] sm:$0xf] %v697_v57  ;;  %v695_v61 = vpack.c.bf16 %v193_v60, %v193_v60  ;;  %v498_v62 = vpop.f32.mrf.mxu1 }
  0xf2   :  { %613 = vst [vmem:[%s1059_s2 + $0x3c] sm:$0xf] %v713_v59  ;;  %v711_v63 = vpack.c.bf16 %v498_v62, %v498_v62  ;;  %v780_v0 = vpop.f32.mrf.mxu0 }
  0xf3   :  { %306 = vst [vmem:[%s1059_s2 + $0x28] sm:$0xf] %v695_v61  ;;  %v700_v1 = vpack.c.bf16 %v780_v0, %v780_v0  ;;  %v812_v2 = vpop.f32.mrf.mxu1 }
  0xf4   :  { %611 = vst [vmem:[%s1059_s2 + $0x2c] sm:$0xf] %v711_v63  ;;  %v716_v3 = vpack.c.bf16 %v812_v2, %v812_v2  ;;  %v206_v4 = vpop.f32.mrf.mxu0 }
  0xf5   :  { %311 = vst [vmem:[%s1059_s2 + $0x50] sm:$0xf] %v700_v1  ;;  %v698_v5 = vpack.c.bf16 %v206_v4, %v206_v4  ;;  %v511_v6 = vpop.f32.mrf.mxu1 }
  0xf6   :  { %616 = vst [vmem:[%s1059_s2 + $0x54] sm:$0xf] %v716_v3  ;;  %v714_v7 = vpack.c.bf16 %v511_v6, %v511_v6  ;;  %v781_v8 = vpop.f32.mrf.mxu0 }
  0xf7   :  { %309 = vst [vmem:[%s1059_s2 + $0x40] sm:$0xf] %v698_v5  ;;  %v701_v9 = vpack.c.bf16 %v781_v8, %v781_v8  ;;  %v813_v10 = vpop.f32.mrf.mxu1 }
  0xf8   :  { %614 = vst [vmem:[%s1059_s2 + $0x44] sm:$0xf] %v714_v7  ;;  %v717_v11 = vpack.c.bf16 %v813_v10, %v813_v10  ;;  %v209_v12 = vpop.f32.mrf.mxu0 }
  0xf9   :  { %312 = vst [vmem:[%s1059_s2 + $0x58] sm:$0xf] %v701_v9  ;;  %v699_v13 = vpack.c.bf16 %v209_v12, %v209_v12  ;;  %v514_v14 = vpop.f32.mrf.mxu1 }
  0xfa   :  { %617 = vst [vmem:[%s1059_s2 + $0x5c] sm:$0xf] %v717_v11  ;;  %v715_v15 = vpack.c.bf16 %v514_v14, %v514_v14  ;;  %v784_v16 = vpop.f32.mrf.mxu0 }
  0xfb   :  { %310 = vst [vmem:[%s1059_s2 + $0x48] sm:$0xf] %v699_v13  ;;  %v704_v17 = vpack.c.bf16 %v784_v16, %v784_v16  ;;  %v816_v18 = vpop.f32.mrf.mxu1 }
  0xfc   :  { %615 = vst [vmem:[%s1059_s2 + $0x4c] sm:$0xf] %v715_v15  ;;  %v720_v19 = vpack.c.bf16 %v816_v18, %v816_v18  ;;  %v222_v20 = vpop.f32.mrf.mxu0 }
  0xfd   :  { %315 = vst [vmem:[%s1059_s2 + $0x70] sm:$0xf] %v704_v17  ;;  %v702_v21 = vpack.c.bf16 %v222_v20, %v222_v20  ;;  %v527_v22 = vpop.f32.mrf.mxu1 }
  0xfe   :  { %620 = vst [vmem:[%s1059_s2 + $0x74] sm:$0xf] %v720_v19  ;;  %v718_v23 = vpack.c.bf16 %v527_v22, %v527_v22  ;;  %v785_v24 = vpop.f32.mrf.mxu0 }
  0xff   :  { %313 = vst [vmem:[%s1059_s2 + $0x60] sm:$0xf] %v702_v21  ;;  %v705_v25 = vpack.c.bf16 %v785_v24, %v785_v24  ;;  %v817_v26 = vpop.f32.mrf.mxu1 }
 0x100   :  { %618 = vst [vmem:[%s1059_s2 + $0x64] sm:$0xf] %v718_v23  ;;  %v721_v27 = vpack.c.bf16 %v817_v26, %v817_v26  ;;  %v225_v28 = vpop.f32.mrf.mxu0 }
 0x101   :  { %316 = vst [vmem:[%s1059_s2 + $0x78] sm:$0xf] %v705_v25  ;;  %v703_v29 = vpack.c.bf16 %v225_v28, %v225_v28  ;;  %v530_v30 = vpop.f32.mrf.mxu1 }
 0x102   :  { %621 = vst [vmem:[%s1059_s2 + $0x7c] sm:$0xf] %v721_v27  ;;  %v719_v31 = vpack.c.bf16 %v530_v30, %v530_v30 }
 0x103   :  { %314 = vst [vmem:[%s1059_s2 + $0x68] sm:$0xf] %v703_v29 }
 0x104   :  { %619 = vst [vmem:[%s1059_s2 + $0x6c] sm:$0xf] %v719_v31 }

// kernel: encoder_forward_passes.7
= control target key start
LH: loop header
LB: loop body
LE: loop exit
PB: predicated region body
PF: predicated region fallthrough
CT: control target
= control target key end

     0   :  { %v759_v1 = vmov 0   ;;  %v466_v25 = vlaneseq  ;;  %s1039_s1 = inlined_call_operand.vmem [shape: bf16[128,256], index: 1, kind: input, shape index: {}]   ;;  %s1040_s0 = inlined_call_operand.vmem [shape: bf16[128,128], index: 0, kind: input, shape index: {}]   ;;  %s1041_s2 = inlined_call_operand.vmem [shape: f32[1,256], index: 2, kind: input, shape index: {}]   ;;  %s1042_s3 = inlined_call_operand.vmem [shape: f32[1,256], index: 3, kind: input, shape index: {}]   ;;  %s1043_s4 = inlined_call_operand.vmem [shape: f32[128,256], index: 4, kind: output, shape index: {}]  }
   0x1   :  { %v727_v0 = vld [vmem:[%s1039_s1 + $0x74] ss:$8 sps:$4 sm:$0xff]   ;;  %284 = vmatprep.mubr.bf16.mxu0 %v759_v1  ;;  %324 = vmatprep.mubr.bf16.mxu1 %v759_v1  ;;  %v729_v2 = vld [vmem:[%s1039_s1 + $0x70] ss:$8 sps:$4 sm:$0xff]   ;;  %v730_v3 = vld [vmem:[%s1039_s1 + $0x64] ss:$8 sps:$4 sm:$0xff]  }
   0x2   :  { %252 = vmatprep.subr.bf16.mxu0 %v727_v0  ;;  %710 = vmatprep.subr.bf16.mxu1 %v727_v0  ;;  %v732_v4 = vld [vmem:[%s1039_s1 + $0x60] ss:$8 sps:$4 sm:$0xff]   ;;  %v733_v5 = vld [vmem:[%s1039_s1 + $0x54] ss:$8 sps:$4 sm:$0xff]   ;;  %v735_v6 = vld [vmem:[%s1039_s1 + $0x50] ss:$8 sps:$4 sm:$0xff]  }
   0x3   :  { %253 = vmatpush1.bf16.msra.mxu0 %v729_v2  ;;  %718 = vmatpush1.bf16.msra.mxu1 %v729_v2  ;;  %v736_v7 = vld [vmem:[%s1039_s1 + $0x44] ss:$8 sps:$4 sm:$0xff]   ;;  %v738_v8 = vld [vmem:[%s1039_s1 + $0x40] ss:$8 sps:$4 sm:$0xff]   ;;  %v739_v9 = vld [vmem:[%s1039_s1 + $0x34] ss:$8 sps:$4 sm:$0xff]  }
   0x4   :  { %254 = vmatprep.subr.bf16.mxu0 %v730_v3  ;;  %711 = vmatprep.subr.bf16.mxu1 %v730_v3  ;;  %v741_v10 = vld [vmem:[%s1039_s1 + $0x30] ss:$8 sps:$4 sm:$0xff]   ;;  %v742_v11 = vld [vmem:[%s1039_s1 + $0x24] ss:$8 sps:$4 sm:$0xff]   ;;  %v744_v12 = vld [vmem:[%s1039_s1 + $0x20] ss:$8 sps:$4 sm:$0xff]  }
   0x5   :  { %v745_v13 = vld [vmem:[%s1039_s1 + $0x14] ss:$8 sps:$4 sm:$0xff]   ;;  %v747_v14 = vld [vmem:[%s1039_s1 + $0x10] ss:$8 sps:$4 sm:$0xff]   ;;  %v748_v15 = vld [vmem:[%s1039_s1 + $0x4] ss:$8 sps:$4 sm:$0xff]  }
   0x6   :  { %v750_v16 = vld [vmem:[%s1039_s1] ss:$8 sps:$4 sm:$0xff]   ;;  %v755_v21 = vld [vmem:[%s1040_s0 + $0x10] sm:$0xff]   ;;  %v757_v23 = vld [vmem:[%s1040_s0 + $0x18] sm:$0xff]   ;;  %v467_v26 = vshrl.u32 %v466_v25, 7 }
   0x7   :  { %255 = vmatpush1.bf16.msra.mxu0 %v732_v4  ;;  %719 = vmatpush1.bf16.msra.mxu1 %v732_v4  ;;  %v751_v17 = vld [vmem:[%s1040_s0] sm:$0xff]   ;;  %v753_v19 = vld [vmem:[%s1040_s0 + $0x8] sm:$0xff]   ;;  %v756_v22 = vld [vmem:[%s1040_s0 + $0x30] sm:$0xff]  }
   0x8   :  { %256 = vmatprep.subr.bf16.mxu0 %v733_v5  ;;  %712 = vmatprep.subr.bf16.mxu1 %v733_v5  ;;  %v752_v18 = vld [vmem:[%s1040_s0 + $0x20] sm:$0xff]   ;;  %v754_v20 = vld [vmem:[%s1040_s0 + $0x28] sm:$0xff]   ;;  %v758_v24 = vld [vmem:[%s1040_s0 + $0x38] sm:$0xff]   ;;  %v468_v27 = vsub.s32 0, %v467_v26  ;;  %v472_v29 = vsub.s32 1, %v467_v26 }
   0x9   :  { %v464_v28 = vld [vmem:[%s1041_s2] sm:$0x3] }
   0xa   :  { %v868_v30 = vrot.slane %v464_v28, %v468_v27  ;;  %v540_v31 = vld [vmem:[%s1042_s3] sm:$0x3]  ;;  %v873_v34 = vrot.slane %v464_v28, %v472_v29 }
   0xb   :  { %257 = vmatpush1.bf16.msra.mxu0 %v735_v6  ;;  %720 = vmatpush1.bf16.msra.mxu1 %v735_v6  ;;  %v876_v36 = vrot.slane %v540_v31, %v468_v27  ;;  %v879_v42 = vrot.slane %v540_v31, %v472_v29 }
   0xc   :  { %258 = vmatprep.subr.bf16.mxu0 %v736_v7  ;;  %713 = vmatprep.subr.bf16.mxu1 %v736_v7 }
   0xf   :  { %259 = vmatpush1.bf16.msra.mxu0 %v738_v8  ;;  %721 = vmatpush1.bf16.msra.mxu1 %v738_v8 }
  0x10   :  { %260 = vmatprep.subr.bf16.mxu0 %v739_v9  ;;  %714 = vmatprep.subr.bf16.mxu1 %v739_v9 }
  0x13   :  { %261 = vmatpush1.bf16.msra.mxu0 %v741_v10  ;;  %722 = vmatpush1.bf16.msra.mxu1 %v741_v10 }
  0x14   :  { %262 = vmatprep.subr.bf16.mxu0 %v742_v11  ;;  %715 = vmatprep.subr.bf16.mxu1 %v742_v11 }
  0x17   :  { %263 = vmatpush1.bf16.msra.mxu0 %v744_v12  ;;  %723 = vmatpush1.bf16.msra.mxu1 %v744_v12 }
  0x18   :  { %264 = vmatprep.subr.bf16.mxu0 %v745_v13  ;;  %716 = vmatprep.subr.bf16.mxu1 %v745_v13 }
  0x1b   :  { %265 = vmatpush1.bf16.msra.mxu0 %v747_v14  ;;  %724 = vmatpush1.bf16.msra.mxu1 %v747_v14 }
  0x1c   :  { %266 = vmatprep.subr.bf16.mxu0 %v748_v15  ;;  %717 = vmatprep.subr.bf16.mxu1 %v748_v15 }
  0x1f   :  { %267 = vmatpush1.bf16.msra.mxu0 %v750_v16  ;;  %725 = vmatpush1.bf16.msra.mxu1 %v750_v16 }
  0x22   :  { %285 = vmatmul.mubr.bf16.vlgmr.msra.gmra.mxu0 %v751_v17  ;;  %325 = vmatmul.mubr.bf16.vlgmr.msra.gmra.mxu1 %v752_v18 }
  0x23   :  { %294 = vmatprep.mubr.bf16.mxu0 %v759_v1  ;;  %334 = vmatprep.mubr.bf16.mxu1 %v759_v1 }
  0x2a   :  { %295 = vmatmul.mubr.bf16.gmra.mxu0 %v753_v19  ;;  %335 = vmatmul.mubr.bf16.gmra.mxu1 %v754_v20 }
  0x2b   :  { %304 = vmatprep.mubr.bf16.mxu0 %v759_v1  ;;  %344 = vmatprep.mubr.bf16.mxu1 %v759_v1 }
  0x32   :  { %305 = vmatmul.mubr.bf16.gmra.mxu0 %v755_v21  ;;  %345 = vmatmul.mubr.bf16.gmra.mxu1 %v756_v22 }
  0x33   :  { %314 = vmatprep.mubr.bf16.mxu0 %v759_v1  ;;  %354 = vmatprep.mubr.bf16.mxu1 %v759_v1 }
  0x3a   :  { %315 = vmatmul.mubr.bf16.gmra.mxu0 %v757_v23  ;;  %355 = vmatmul.mubr.bf16.gmra.mxu1 %v758_v24 }
  0xe2   :  { %v286_v32 = vpop.f32.mrf.mxu0  ;;  %v326_v33 = vpop.f32.mrf.mxu1 }
  0xe3   :  { %v476_v35 = vadd.f32 %v868_v30, %v286_v32  ;;  %v492_v37 = vadd.f32 %v868_v30, %v326_v33 }
  0xe4   :  { %v288_v38 = vpop.f32.mrf.mxu0  ;;  %v328_v39 = vpop.f32.mrf.mxu1 }
  0xe5   :  { %v541_v40 = vmin.f32 %v476_v35, 0.0  ;;  %v557_v41 = vmin.f32 %v492_v37, 0.0  ;;  %v508_v43 = vmax.f32 %v476_v35, 0.0  ;;  %v524_v44 = vmax.f32 %v492_v37, 0.0 }
  0xe6   :  { %v477_v45 = vadd.f32 %v873_v34, %v288_v38  ;;  %v493_v46 = vadd.f32 %v873_v34, %v328_v39  ;;  %v290_v47 = vpop.f32.mrf.mxu0  ;;  %v330_v48 = vpop.f32.mrf.mxu1 }
  0xe7   :  { %v584_v49 = vmul.f32 %v876_v36, %v541_v40  ;;  %v600_v50 = vmul.f32 %v876_v36, %v557_v41  ;;  %v478_v51 = vadd.f32 %v868_v30, %v290_v47  ;;  %v494_v52 = vadd.f32 %v868_v30, %v330_v48 }
  0xe8   :  { %v509_v53 = vmax.f32 %v477_v45, 0.0  ;;  %v542_v54 = vmin.f32 %v477_v45, 0.0  ;;  %v525_v55 = vmax.f32 %v493_v46, 0.0  ;;  %v558_v56 = vmin.f32 %v493_v46, 0.0  ;;  %v292_v57 = vpop.f32.mrf.mxu0  ;;  %v332_v58 = vpop.f32.mrf.mxu1 }
  0xe9   :  { %v616_v59 = vadd.f32 %v584_v49, %v508_v43  ;;  %v632_v60 = vadd.f32 %v600_v50, %v524_v44  ;;  %v510_v61 = vmax.f32 %v478_v51, 0.0  ;;  %v543_v62 = vmin.f32 %v478_v51, 0.0 }
  0xea   :  { %v585_v63 = vmul.f32 %v879_v42, %v542_v54  ;;  %v601_v0 = vmul.f32 %v879_v42, %v558_v56  ;;  %v526_v1 = vmax.f32 %v494_v52, 0.0  ;;  %v559_v2 = vmin.f32 %v494_v52, 0.0  ;;  %v296_v3 = vpop.f32.mrf.mxu0  ;;  %v336_v4 = vpop.f32.mrf.mxu1 }
  0xeb   :  { %648 = vst [vmem:[%s1043_s4] sm:$0xff] %v616_v59  ;;  %664 = vst [vmem:[%s1043_s4 + $0x80] sm:$0xff] %v632_v60  ;;  %v586_v5 = vmul.f32 %v876_v36, %v543_v62  ;;  %v479_v6 = vadd.f32 %v873_v34, %v292_v57  ;;  %v495_v7 = vadd.f32 %v873_v34, %v332_v58 }
  0xec   :  { %v480_v8 = vadd.f32 %v868_v30, %v296_v3  ;;  %v617_v9 = vadd.f32 %v585_v63, %v509_v53  ;;  %v633_v10 = vadd.f32 %v601_v0, %v525_v55  ;;  %v602_v11 = vmul.f32 %v876_v36, %v559_v2  ;;  %v298_v13 = vpop.f32.mrf.mxu0  ;;  %v338_v14 = vpop.f32.mrf.mxu1 }
  0xed   :  { %v496_v12 = vadd.f32 %v868_v30, %v336_v4  ;;  %v618_v15 = vadd.f32 %v586_v5, %v510_v61  ;;  %v511_v16 = vmax.f32 %v479_v6, 0.0  ;;  %v544_v17 = vmin.f32 %v479_v6, 0.0 }
  0xee   :  { %v527_v18 = vmax.f32 %v495_v7, 0.0  ;;  %649 = vst [vmem:[%s1043_s4 + $0x8] sm:$0xff] %v617_v9  ;;  %665 = vst [vmem:[%s1043_s4 + $0x88] sm:$0xff] %v633_v10  ;;  %v634_v19 = vadd.f32 %v602_v11, %v526_v1  ;;  %v560_v20 = vmin.f32 %v495_v7, 0.0  ;;  %v512_v21 = vmax.f32 %v480_v8, 0.0  ;;  %v300_v23 = vpop.f32.mrf.mxu0  ;;  %v340_v24 = vpop.f32.mrf.mxu1 }
  0xef   :  { %v545_v22 = vmin.f32 %v480_v8, 0.0  ;;  %650 = vst [vmem:[%s1043_s4 + $0x10] sm:$0xff] %v618_v15  ;;  %v587_v25 = vmul.f32 %v879_v42, %v544_v17  ;;  %v528_v26 = vmax.f32 %v496_v12, 0.0  ;;  %v561_v27 = vmin.f32 %v496_v12, 0.0 }
  0xf0   :  { %v481_v28 = vadd.f32 %v873_v34, %v298_v13  ;;  %666 = vst [vmem:[%s1043_s4 + $0x90] sm:$0xff] %v634_v19  ;;  %v603_v29 = vmul.f32 %v879_v42, %v560_v20  ;;  %v497_v32 = vadd.f32 %v873_v34, %v338_v14  ;;  %v482_v33 = vadd.f32 %v868_v30, %v300_v23  ;;  %v302_v35 = vpop.f32.mrf.mxu0  ;;  %v342_v37 = vpop.f32.mrf.mxu1 }
  0xf1   :  { %v588_v31 = vmul.f32 %v876_v36, %v545_v22  ;;  %v619_v38 = vadd.f32 %v587_v25, %v511_v16  ;;  %v604_v39 = vmul.f32 %v876_v36, %v561_v27  ;;  %v498_v54 = vadd.f32 %v868_v30, %v340_v24 }
  0xf2   :  { %v513_v40 = vmax.f32 %v481_v28, 0.0  ;;  %v546_v41 = vmin.f32 %v481_v28, 0.0  ;;  %v635_v43 = vadd.f32 %v603_v29, %v527_v18  ;;  %v529_v45 = vmax.f32 %v497_v32, 0.0  ;;  %v306_v47 = vpop.f32.mrf.mxu0  ;;  %v346_v48 = vpop.f32.mrf.mxu1 }
  0xf3   :  { %v620_v44 = vadd.f32 %v588_v31, %v512_v21  ;;  %v562_v46 = vmin.f32 %v497_v32, 0.0  ;;  %651 = vst [vmem:[%s1043_s4 + $0x18] sm:$0xff] %v619_v38  ;;  %v636_v49 = vadd.f32 %v604_v39, %v528_v26  ;;  %v514_v51 = vmax.f32 %v482_v33, 0.0 }
  0xf4   :  { %v589_v50 = vmul.f32 %v879_v42, %v546_v41  ;;  %v547_v52 = vmin.f32 %v482_v33, 0.0  ;;  %667 = vst [vmem:[%s1043_s4 + $0x98] sm:$0xff] %v635_v43  ;;  %v483_v55 = vadd.f32 %v873_v34, %v302_v35  ;;  %v499_v56 = vadd.f32 %v873_v34, %v342_v37  ;;  %v308_v57 = vpop.f32.mrf.mxu0  ;;  %v348_v58 = vpop.f32.mrf.mxu1 }
  0xf5   :  { %652 = vst [vmem:[%s1043_s4 + $0x20] sm:$0xff] %v620_v44  ;;  %v605_v53 = vmul.f32 %v879_v42, %v562_v46  ;;  %668 = vst [vmem:[%s1043_s4 + $0xa0] sm:$0xff] %v636_v49  ;;  %v484_v61 = vadd.f32 %v868_v30, %v306_v47  ;;  %v500_v62 = vadd.f32 %v868_v30, %v346_v48  ;;  %v530_v0 = vmax.f32 %v498_v54, 0.0 }
  0xf6   :  { %v621_v59 = vadd.f32 %v589_v50, %v513_v40  ;;  %v590_v60 = vmul.f32 %v876_v36, %v547_v52  ;;  %v563_v1 = vmin.f32 %v498_v54, 0.0  ;;  %v310_v2 = vpop.f32.mrf.mxu0  ;;  %v350_v3 = vpop.f32.mrf.mxu1  ;;  %v515_v5 = vmax.f32 %v483_v55, 0.0 }
  0xf7   :  { %v637_v63 = vadd.f32 %v605_v53, %v529_v45  ;;  %v548_v6 = vmin.f32 %v483_v55, 0.0  ;;  %v564_v7 = vmin.f32 %v499_v56, 0.0  ;;  %v531_v9 = vmax.f32 %v499_v56, 0.0 }
  0xf8   :  { %653 = vst [vmem:[%s1043_s4 + $0x28] sm:$0xff] %v621_v59  ;;  %v622_v4 = vadd.f32 %v590_v60, %v514_v51  ;;  %v606_v8 = vmul.f32 %v876_v36, %v563_v1  ;;  %v516_v10 = vmax.f32 %v484_v61, 0.0  ;;  %v549_v11 = vmin.f32 %v484_v61, 0.0  ;;  %v312_v12 = vpop.f32.mrf.mxu0  ;;  %v352_v13 = vpop.f32.mrf.mxu1 }
  0xf9   :  { %669 = vst [vmem:[%s1043_s4 + $0xa8] sm:$0xff] %v637_v63  ;;  %v591_v14 = vmul.f32 %v879_v42, %v548_v6  ;;  %v607_v15 = vmul.f32 %v879_v42, %v564_v7  ;;  %v565_v16 = vmin.f32 %v500_v62, 0.0  ;;  %v485_v17 = vadd.f32 %v873_v34, %v308_v57 }
  0xfa   :  { %654 = vst [vmem:[%s1043_s4 + $0x30] sm:$0xff] %v622_v4  ;;  %v638_v18 = vadd.f32 %v606_v8, %v530_v0  ;;  %v592_v19 = vmul.f32 %v876_v36, %v549_v11  ;;  %v501_v20 = vadd.f32 %v873_v34, %v348_v58  ;;  %v486_v21 = vadd.f32 %v868_v30, %v310_v2  ;;  %v316_v22 = vpop.f32.mrf.mxu0  ;;  %v356_v23 = vpop.f32.mrf.mxu1 }
  0xfb   :  { %v623_v24 = vadd.f32 %v591_v14, %v515_v5  ;;  %v639_v25 = vadd.f32 %v607_v15, %v531_v9  ;;  %v532_v26 = vmax.f32 %v500_v62, 0.0  ;;  %v608_v27 = vmul.f32 %v876_v36, %v565_v16 }
  0xfc   :  { %670 = vst [vmem:[%s1043_s4 + $0xb0] sm:$0xff] %v638_v18  ;;  %v624_v28 = vadd.f32 %v592_v19, %v516_v10  ;;  %v517_v29 = vmax.f32 %v485_v17, 0.0  ;;  %v550_v31 = vmin.f32 %v485_v17, 0.0  ;;  %v566_v32 = vmin.f32 %v501_v20, 0.0  ;;  %v318_v33 = vpop.f32.mrf.mxu0  ;;  %v358_v35 = vpop.f32.mrf.mxu1 }
  0xfd   :  { %655 = vst [vmem:[%s1043_s4 + $0x38] sm:$0xff] %v623_v24  ;;  %671 = vst [vmem:[%s1043_s4 + $0xb8] sm:$0xff] %v639_v25  ;;  %v640_v37 = vadd.f32 %v608_v27, %v532_v26  ;;  %v533_v38 = vmax.f32 %v501_v20, 0.0  ;;  %v551_v39 = vmin.f32 %v486_v21, 0.0  ;;  %v502_v40 = vadd.f32 %v868_v30, %v350_v3 }
  0xfe   :  { %656 = vst [vmem:[%s1043_s4 + $0x40] sm:$0xff] %v624_v28  ;;  %v593_v41 = vmul.f32 %v879_v42, %v550_v31  ;;  %v609_v43 = vmul.f32 %v879_v42, %v566_v32  ;;  %v487_v44 = vadd.f32 %v873_v34, %v312_v12  ;;  %v503_v45 = vadd.f32 %v873_v34, %v352_v13  ;;  %v320_v54 = vpop.f32.mrf.mxu0  ;;  %v360_v55 = vpop.f32.mrf.mxu1 }
  0xff   :  { %672 = vst [vmem:[%s1043_s4 + $0xc0] sm:$0xff] %v640_v37  ;;  %v518_v46 = vmax.f32 %v486_v21, 0.0  ;;  %v594_v47 = vmul.f32 %v876_v36, %v551_v39  ;;  %v567_v48 = vmin.f32 %v502_v40, 0.0  ;;  %v488_v49 = vadd.f32 %v868_v30, %v316_v22 }
 0x100   :  { %v625_v50 = vadd.f32 %v593_v41, %v517_v29  ;;  %v641_v51 = vadd.f32 %v609_v43, %v533_v38  ;;  %v534_v52 = vmax.f32 %v502_v40, 0.0  ;;  %v552_v53 = vmin.f32 %v487_v44, 0.0  ;;  %v322_v8 = vpop.f32.mrf.mxu0  ;;  %v362_v9 = vpop.f32.mrf.mxu1 }
 0x101   :  { %v626_v56 = vadd.f32 %v594_v47, %v518_v46  ;;  %v610_v57 = vmul.f32 %v876_v36, %v567_v48  ;;  %v519_v58 = vmax.f32 %v487_v44, 0.0  ;;  %v568_v59 = vmin.f32 %v503_v45, 0.0 }
 0x102   :  { %657 = vst [vmem:[%s1043_s4 + $0x48] sm:$0xff] %v625_v50  ;;  %673 = vst [vmem:[%s1043_s4 + $0xc8] sm:$0xff] %v641_v51  ;;  %v595_v60 = vmul.f32 %v879_v42, %v552_v53  ;;  %v535_v61 = vmax.f32 %v503_v45, 0.0  ;;  %v553_v62 = vmin.f32 %v488_v49, 0.0  ;;  %v504_v63 = vadd.f32 %v868_v30, %v356_v23 }
 0x103   :  { %658 = vst [vmem:[%s1043_s4 + $0x50] sm:$0xff] %v626_v56  ;;  %v642_v0 = vadd.f32 %v610_v57, %v534_v52  ;;  %v611_v1 = vmul.f32 %v879_v42, %v568_v59  ;;  %v489_v2 = vadd.f32 %v873_v34, %v318_v33  ;;  %v505_v3 = vadd.f32 %v873_v34, %v358_v35 }
 0x104   :  { %v627_v4 = vadd.f32 %v595_v60, %v519_v58  ;;  %v520_v5 = vmax.f32 %v488_v49, 0.0  ;;  %v596_v6 = vmul.f32 %v876_v36, %v553_v62  ;;  %v569_v7 = vmin.f32 %v504_v63, 0.0 }
 0x105   :  { %674 = vst [vmem:[%s1043_s4 + $0xd0] sm:$0xff] %v642_v0  ;;  %v643_v10 = vadd.f32 %v611_v1, %v535_v61  ;;  %v536_v11 = vmax.f32 %v504_v63, 0.0  ;;  %v521_v12 = vmax.f32 %v489_v2, 0.0  ;;  %v554_v13 = vmin.f32 %v489_v2, 0.0 }
 0x106   :  { %659 = vst [vmem:[%s1043_s4 + $0x58] sm:$0xff] %v627_v4  ;;  %v628_v14 = vadd.f32 %v596_v6, %v520_v5  ;;  %v612_v15 = vmul.f32 %v876_v36, %v569_v7  ;;  %v570_v16 = vmin.f32 %v505_v3, 0.0  ;;  %v490_v17 = vadd.f32 %v868_v30, %v320_v54 }
 0x107   :  { %675 = vst [vmem:[%s1043_s4 + $0xd8] sm:$0xff] %v643_v10  ;;  %v597_v18 = vmul.f32 %v879_v42, %v554_v13  ;;  %v506_v19 = vadd.f32 %v868_v30, %v360_v55  ;;  %v491_v20 = vadd.f32 %v873_v34, %v322_v8  ;;  %v507_v21 = vadd.f32 %v873_v34, %v362_v9 }
 0x108   :  { %660 = vst [vmem:[%s1043_s4 + $0x60] sm:$0xff] %v628_v14  ;;  %v644_v22 = vadd.f32 %v612_v15, %v536_v11  ;;  %v537_v23 = vmax.f32 %v505_v3, 0.0  ;;  %v613_v24 = vmul.f32 %v879_v42, %v570_v16  ;;  %v555_v25 = vmin.f32 %v490_v17, 0.0 }
 0x109   :  { %v629_v26 = vadd.f32 %v597_v18, %v521_v12  ;;  %v571_v27 = vmin.f32 %v506_v19, 0.0  ;;  %v522_v28 = vmax.f32 %v490_v17, 0.0  ;;  %v556_v34 = vmin.f32 %v491_v20, 0.0 }
 0x10a   :  { %676 = vst [vmem:[%s1043_s4 + $0xe0] sm:$0xff] %v644_v22  ;;  %v645_v30 = vadd.f32 %v613_v24, %v537_v23  ;;  %v598_v29 = vmul.f32 %v876_v36, %v555_v25  ;;  %v538_v31 = vmax.f32 %v506_v19, 0.0  ;;  %v572_v33 = vmin.f32 %v507_v21, 0.0 }
 0x10b   :  { %661 = vst [vmem:[%s1043_s4 + $0x68] sm:$0xff] %v629_v26  ;;  %v614_v32 = vmul.f32 %v876_v36, %v571_v27  ;;  %v523_v37 = vmax.f32 %v491_v20, 0.0  ;;  %v599_v38 = vmul.f32 %v879_v42, %v556_v34  ;;  %v539_v40 = vmax.f32 %v507_v21, 0.0 }
 0x10c   :  { %677 = vst [vmem:[%s1043_s4 + $0xe8] sm:$0xff] %v645_v30  ;;  %v630_v35 = vadd.f32 %v598_v29, %v522_v28  ;;  %v615_v41 = vmul.f32 %v879_v42, %v572_v33 }
 0x10d   :  { %v646_v39 = vadd.f32 %v614_v32, %v538_v31  ;;  %v631_v43 = vadd.f32 %v599_v38, %v523_v37 }
 0x10e   :  { %662 = vst [vmem:[%s1043_s4 + $0x70] sm:$0xff] %v630_v35  ;;  %v647_v36 = vadd.f32 %v615_v41, %v539_v40 }
 0x10f   :  { %678 = vst [vmem:[%s1043_s4 + $0xf0] sm:$0xff] %v646_v39  ;;  %663 = vst [vmem:[%s1043_s4 + $0x78] sm:$0xff] %v631_v43 }
 0x110   :  { %679 = vst [vmem:[%s1043_s4 + $0xf8] sm:$0xff] %v647_v36 }

// kernel: encoder_forward_passes.5
= control target key start
LH: loop header
LB: loop body
LE: loop exit
PB: predicated region body
PF: predicated region fallthrough
CT: control target
= control target key end

     0   :  { %v871_v1 = vmov 0   ;;  %v466_v25 = vlaneseq  ;;  %s1103_s1 = inlined_call_operand.vmem [shape: bf16[128,256], index: 1, kind: input, shape index: {}]   ;;  %s1104_s0 = inlined_call_operand.vmem [shape: bf16[128,128], index: 0, kind: input, shape index: {}]   ;;  %s1105_s2 = inlined_call_operand.vmem [shape: f32[1,256], index: 2, kind: input, shape index: {}]   ;;  %s1106_s3 = inlined_call_operand.vmem [shape: f32[1,256], index: 3, kind: input, shape index: {}]   ;;  %s1107_s4 = inlined_call_operand.vmem [shape: bf16[128,256], index: 4, kind: output, shape index: {}]  }
   0x1   :  { %v839_v0 = vld [vmem:[%s1103_s1 + $0x74] ss:$8 sps:$4 sm:$0xff]   ;;  %284 = vmatprep.mubr.bf16.mxu0 %v871_v1  ;;  %324 = vmatprep.mubr.bf16.mxu1 %v871_v1  ;;  %v841_v2 = vld [vmem:[%s1103_s1 + $0x70] ss:$8 sps:$4 sm:$0xff]   ;;  %v842_v3 = vld [vmem:[%s1103_s1 + $0x64] ss:$8 sps:$4 sm:$0xff]  }
   0x2   :  { %252 = vmatprep.subr.bf16.mxu0 %v839_v0  ;;  %822 = vmatprep.subr.bf16.mxu1 %v839_v0  ;;  %v844_v4 = vld [vmem:[%s1103_s1 + $0x60] ss:$8 sps:$4 sm:$0xff]   ;;  %v845_v5 = vld [vmem:[%s1103_s1 + $0x54] ss:$8 sps:$4 sm:$0xff]   ;;  %v847_v6 = vld [vmem:[%s1103_s1 + $0x50] ss:$8 sps:$4 sm:$0xff]  }
   0x3   :  { %253 = vmatpush1.bf16.msra.mxu0 %v841_v2  ;;  %830 = vmatpush1.bf16.msra.mxu1 %v841_v2  ;;  %v848_v7 = vld [vmem:[%s1103_s1 + $0x44] ss:$8 sps:$4 sm:$0xff]   ;;  %v850_v8 = vld [vmem:[%s1103_s1 + $0x40] ss:$8 sps:$4 sm:$0xff]   ;;  %v851_v9 = vld [vmem:[%s1103_s1 + $0x34] ss:$8 sps:$4 sm:$0xff]  }
   0x4   :  { %254 = vmatprep.subr.bf16.mxu0 %v842_v3  ;;  %823 = vmatprep.subr.bf16.mxu1 %v842_v3  ;;  %v853_v10 = vld [vmem:[%s1103_s1 + $0x30] ss:$8 sps:$4 sm:$0xff]   ;;  %v854_v11 = vld [vmem:[%s1103_s1 + $0x24] ss:$8 sps:$4 sm:$0xff]   ;;  %v856_v12 = vld [vmem:[%s1103_s1 + $0x20] ss:$8 sps:$4 sm:$0xff]  }
   0x5   :  { %v857_v13 = vld [vmem:[%s1103_s1 + $0x14] ss:$8 sps:$4 sm:$0xff]   ;;  %v859_v14 = vld [vmem:[%s1103_s1 + $0x10] ss:$8 sps:$4 sm:$0xff]   ;;  %v860_v15 = vld [vmem:[%s1103_s1 + $0x4] ss:$8 sps:$4 sm:$0xff]  }
   0x6   :  { %v862_v16 = vld [vmem:[%s1103_s1] ss:$8 sps:$4 sm:$0xff]   ;;  %v867_v21 = vld [vmem:[%s1104_s0 + $0x10] sm:$0xff]   ;;  %v869_v23 = vld [vmem:[%s1104_s0 + $0x18] sm:$0xff]   ;;  %v467_v26 = vshrl.u32 %v466_v25, 7 }
   0x7   :  { %255 = vmatpush1.bf16.msra.mxu0 %v844_v4  ;;  %831 = vmatpush1.bf16.msra.mxu1 %v844_v4  ;;  %v863_v17 = vld [vmem:[%s1104_s0] sm:$0xff]   ;;  %v865_v19 = vld [vmem:[%s1104_s0 + $0x8] sm:$0xff]   ;;  %v868_v22 = vld [vmem:[%s1104_s0 + $0x30] sm:$0xff]  }
   0x8   :  { %256 = vmatprep.subr.bf16.mxu0 %v845_v5  ;;  %824 = vmatprep.subr.bf16.mxu1 %v845_v5  ;;  %v864_v18 = vld [vmem:[%s1104_s0 + $0x20] sm:$0xff]   ;;  %v866_v20 = vld [vmem:[%s1104_s0 + $0x28] sm:$0xff]   ;;  %v870_v24 = vld [vmem:[%s1104_s0 + $0x38] sm:$0xff]   ;;  %v468_v27 = vsub.s32 0, %v467_v26  ;;  %v472_v29 = vsub.s32 1, %v467_v26 }
   0x9   :  { %v464_v28 = vld [vmem:[%s1105_s2] sm:$0x3] }
   0xa   :  { %v980_v30 = vrot.slane %v464_v28, %v468_v27  ;;  %v540_v31 = vld [vmem:[%s1106_s3] sm:$0x3]  ;;  %v985_v34 = vrot.slane %v464_v28, %v472_v29 }
   0xb   :  { %257 = vmatpush1.bf16.msra.mxu0 %v847_v6  ;;  %832 = vmatpush1.bf16.msra.mxu1 %v847_v6  ;;  %v988_v36 = vrot.slane %v540_v31, %v468_v27  ;;  %v992_v44 = vrot.slane %v540_v31, %v472_v29 }
   0xc   :  { %258 = vmatprep.subr.bf16.mxu0 %v848_v7  ;;  %825 = vmatprep.subr.bf16.mxu1 %v848_v7 }
   0xf   :  { %259 = vmatpush1.bf16.msra.mxu0 %v850_v8  ;;  %833 = vmatpush1.bf16.msra.mxu1 %v850_v8 }
  0x10   :  { %260 = vmatprep.subr.bf16.mxu0 %v851_v9  ;;  %826 = vmatprep.subr.bf16.mxu1 %v851_v9 }
  0x13   :  { %261 = vmatpush1.bf16.msra.mxu0 %v853_v10  ;;  %834 = vmatpush1.bf16.msra.mxu1 %v853_v10 }
  0x14   :  { %262 = vmatprep.subr.bf16.mxu0 %v854_v11  ;;  %827 = vmatprep.subr.bf16.mxu1 %v854_v11 }
  0x17   :  { %263 = vmatpush1.bf16.msra.mxu0 %v856_v12  ;;  %835 = vmatpush1.bf16.msra.mxu1 %v856_v12 }
  0x18   :  { %264 = vmatprep.subr.bf16.mxu0 %v857_v13  ;;  %828 = vmatprep.subr.bf16.mxu1 %v857_v13 }
  0x1b   :  { %265 = vmatpush1.bf16.msra.mxu0 %v859_v14  ;;  %836 = vmatpush1.bf16.msra.mxu1 %v859_v14 }
  0x1c   :  { %266 = vmatprep.subr.bf16.mxu0 %v860_v15  ;;  %829 = vmatprep.subr.bf16.mxu1 %v860_v15 }
  0x1f   :  { %267 = vmatpush1.bf16.msra.mxu0 %v862_v16  ;;  %837 = vmatpush1.bf16.msra.mxu1 %v862_v16 }
  0x22   :  { %285 = vmatmul.mubr.bf16.vlgmr.msra.gmra.mxu0 %v863_v17  ;;  %325 = vmatmul.mubr.bf16.vlgmr.msra.gmra.mxu1 %v864_v18 }
  0x23   :  { %294 = vmatprep.mubr.bf16.mxu0 %v871_v1  ;;  %334 = vmatprep.mubr.bf16.mxu1 %v871_v1 }
  0x2a   :  { %295 = vmatmul.mubr.bf16.gmra.mxu0 %v865_v19  ;;  %335 = vmatmul.mubr.bf16.gmra.mxu1 %v866_v20 }
  0x2b   :  { %304 = vmatprep.mubr.bf16.mxu0 %v871_v1  ;;  %344 = vmatprep.mubr.bf16.mxu1 %v871_v1 }
  0x32   :  { %305 = vmatmul.mubr.bf16.gmra.mxu0 %v867_v21  ;;  %345 = vmatmul.mubr.bf16.gmra.mxu1 %v868_v22 }
  0x33   :  { %314 = vmatprep.mubr.bf16.mxu0 %v871_v1  ;;  %354 = vmatprep.mubr.bf16.mxu1 %v871_v1 }
  0x3a   :  { %315 = vmatmul.mubr.bf16.gmra.mxu0 %v869_v23  ;;  %355 = vmatmul.mubr.bf16.gmra.mxu1 %v870_v24 }
  0xe2   :  { %v286_v32 = vpop.f32.mrf.mxu0  ;;  %v326_v33 = vpop.f32.mrf.mxu1 }
  0xe3   :  { %v476_v35 = vadd.f32 %v980_v30, %v286_v32  ;;  %v492_v37 = vadd.f32 %v980_v30, %v326_v33 }
  0xe4   :  { %v288_v38 = vpop.f32.mrf.mxu0  ;;  %v328_v39 = vpop.f32.mrf.mxu1 }
  0xe5   :  { %v541_v40 = vmin.f32 %v476_v35, 0.0  ;;  %v557_v41 = vmin.f32 %v492_v37, 0.0  ;;  %v508_v42 = vmax.f32 %v476_v35, 0.0  ;;  %v477_v43 = vadd.f32 %v985_v34, %v288_v38 }
  0xe6   :  { %v493_v45 = vadd.f32 %v985_v34, %v328_v39  ;;  %v290_v46 = vpop.f32.mrf.mxu0  ;;  %v330_v47 = vpop.f32.mrf.mxu1  ;;  %v524_v52 = vmax.f32 %v492_v37, 0.0 }
  0xe7   :  { %v584_v48 = vmul.f32 %v988_v36, %v541_v40  ;;  %v600_v49 = vmul.f32 %v988_v36, %v557_v41  ;;  %v478_v50 = vadd.f32 %v980_v30, %v290_v46  ;;  %v494_v51 = vadd.f32 %v980_v30, %v330_v47 }
  0xe8   :  { %v542_v53 = vmin.f32 %v477_v43, 0.0  ;;  %v558_v54 = vmin.f32 %v493_v45, 0.0  ;;  %v292_v55 = vpop.f32.mrf.mxu0  ;;  %v332_v56 = vpop.f32.mrf.mxu1  ;;  %v509_v58 = vmax.f32 %v477_v43, 0.0  ;;  %v525_v59 = vmax.f32 %v493_v45, 0.0 }
  0xe9   :  { %v616_v57 = vadd.f32 %v584_v48, %v508_v42  ;;  %v543_v60 = vmin.f32 %v478_v50, 0.0  ;;  %v632_v61 = vadd.f32 %v600_v49, %v524_v52  ;;  %v559_v0 = vmin.f32 %v494_v51, 0.0 }
  0xea   :  { %v585_v62 = vmul.f32 %v992_v44, %v542_v53  ;;  %v601_v63 = vmul.f32 %v992_v44, %v558_v54  ;;  %v296_v1 = vpop.f32.mrf.mxu0  ;;  %v336_v2 = vpop.f32.mrf.mxu1  ;;  %v479_v4 = vadd.f32 %v985_v34, %v292_v55  ;;  %v495_v5 = vadd.f32 %v985_v34, %v332_v56 }
  0xeb   :  { %v586_v3 = vmul.f32 %v988_v36, %v543_v60  ;;  %v480_v6 = vadd.f32 %v980_v30, %v296_v1  ;;  %v510_v9 = vmax.f32 %v478_v50, 0.0  ;;  %v496_v10 = vadd.f32 %v980_v30, %v336_v2 }
  0xec   :  { %v617_v7 = vadd.f32 %v585_v62, %v509_v58  ;;  %v633_v8 = vadd.f32 %v601_v63, %v525_v59  ;;  %v298_v11 = vpop.f32.mrf.mxu0  ;;  %v338_v12 = vpop.f32.mrf.mxu1  ;;  %v526_v13 = vmax.f32 %v494_v51, 0.0  ;;  %v602_v14 = vmul.f32 %v988_v36, %v559_v0 }
  0xed   :  { %v544_v15 = vmin.f32 %v479_v4, 0.0  ;;  %v618_v18 = vadd.f32 %v586_v3, %v510_v9  ;;  %v560_v19 = vmin.f32 %v495_v5, 0.0  ;;  %v511_v22 = vmax.f32 %v479_v4, 0.0 }
  0xee   :  { %v806_v16 = vpack.c.bf16 %v617_v7, %v616_v57  ;;  %v814_v17 = vpack.c.bf16 %v633_v8, %v632_v61  ;;  %v300_v20 = vpop.f32.mrf.mxu0  ;;  %v340_v21 = vpop.f32.mrf.mxu1  ;;  %v527_v24 = vmax.f32 %v495_v5, 0.0  ;;  %v545_v25 = vmin.f32 %v480_v6, 0.0 }
  0xef   :  { %v587_v23 = vmul.f32 %v992_v44, %v544_v15  ;;  %v603_v26 = vmul.f32 %v992_v44, %v560_v19  ;;  %v561_v27 = vmin.f32 %v496_v10, 0.0  ;;  %v481_v28 = vadd.f32 %v985_v34, %v298_v11 }
  0xf0   :  { %744 = vst [vmem:[%s1107_s4] sm:$0xff] %v806_v16  ;;  %752 = vst [vmem:[%s1107_s4 + $0x40] sm:$0xff] %v814_v17  ;;  %v497_v29 = vadd.f32 %v985_v34, %v338_v12  ;;  %v302_v31 = vpop.f32.mrf.mxu0  ;;  %v342_v32 = vpop.f32.mrf.mxu1  ;;  %v588_v35 = vmul.f32 %v988_v36, %v545_v25  ;;  %v482_v37 = vadd.f32 %v980_v30, %v300_v20  ;;  %v512_v41 = vmax.f32 %v480_v6, 0.0 }
  0xf1   :  { %v619_v33 = vadd.f32 %v587_v23, %v511_v22  ;;  %v498_v38 = vadd.f32 %v980_v30, %v340_v21  ;;  %v634_v39 = vadd.f32 %v602_v14, %v526_v13  ;;  %v635_v40 = vadd.f32 %v603_v26, %v527_v24 }
  0xf2   :  { %v546_v42 = vmin.f32 %v481_v28, 0.0  ;;  %v306_v43 = vpop.f32.mrf.mxu0  ;;  %v346_v45 = vpop.f32.mrf.mxu1  ;;  %v528_v47 = vmax.f32 %v496_v10, 0.0  ;;  %v604_v48 = vmul.f32 %v988_v36, %v561_v27  ;;  %v562_v49 = vmin.f32 %v497_v29, 0.0 }
  0xf3   :  { %v807_v46 = vpack.c.bf16 %v619_v33, %v618_v18  ;;  %v815_v50 = vpack.c.bf16 %v635_v40, %v634_v39  ;;  %v620_v51 = vadd.f32 %v588_v35, %v512_v41  ;;  %v513_v52 = vmax.f32 %v481_v28, 0.0 }
  0xf4   :  { %v589_v53 = vmul.f32 %v992_v44, %v546_v42  ;;  %v308_v54 = vpop.f32.mrf.mxu0  ;;  %v348_v55 = vpop.f32.mrf.mxu1  ;;  %v529_v56 = vmax.f32 %v497_v29, 0.0  ;;  %v605_v57 = vmul.f32 %v992_v44, %v562_v49  ;;  %v547_v58 = vmin.f32 %v482_v37, 0.0 }
  0xf5   :  { %745 = vst [vmem:[%s1107_s4 + $0x8] sm:$0xff] %v807_v46  ;;  %v563_v59 = vmin.f32 %v498_v38, 0.0  ;;  %753 = vst [vmem:[%s1107_s4 + $0x48] sm:$0xff] %v815_v50  ;;  %v483_v61 = vadd.f32 %v985_v34, %v302_v31  ;;  %v499_v62 = vadd.f32 %v985_v34, %v342_v32  ;;  %v484_v63 = vadd.f32 %v980_v30, %v306_v43 }
  0xf6   :  { %v621_v60 = vadd.f32 %v589_v53, %v513_v52  ;;  %v310_v0 = vpop.f32.mrf.mxu0  ;;  %v350_v1 = vpop.f32.mrf.mxu1  ;;  %v636_v2 = vadd.f32 %v604_v48, %v528_v47  ;;  %v637_v3 = vadd.f32 %v605_v57, %v529_v56  ;;  %v590_v4 = vmul.f32 %v988_v36, %v547_v58 }
  0xf7   :  { %v500_v5 = vadd.f32 %v980_v30, %v346_v45  ;;  %v514_v7 = vmax.f32 %v482_v37, 0.0  ;;  %v530_v8 = vmax.f32 %v498_v38, 0.0  ;;  %v548_v9 = vmin.f32 %v483_v61, 0.0 }
  0xf8   :  { %v808_v6 = vpack.c.bf16 %v621_v60, %v620_v51  ;;  %v312_v10 = vpop.f32.mrf.mxu0  ;;  %v352_v11 = vpop.f32.mrf.mxu1  ;;  %v816_v12 = vpack.c.bf16 %v637_v3, %v636_v2  ;;  %v606_v13 = vmul.f32 %v988_v36, %v563_v59  ;;  %v515_v14 = vmax.f32 %v483_v61, 0.0 }
  0xf9   :  { %v564_v15 = vmin.f32 %v499_v62, 0.0  ;;  %v622_v16 = vadd.f32 %v590_v4, %v514_v7  ;;  %v591_v17 = vmul.f32 %v992_v44, %v548_v9  ;;  %v531_v18 = vmax.f32 %v499_v62, 0.0 }
  0xfa   :  { %746 = vst [vmem:[%s1107_s4 + $0x10] sm:$0xff] %v808_v6  ;;  %v549_v19 = vmin.f32 %v484_v63, 0.0  ;;  %754 = vst [vmem:[%s1107_s4 + $0x50] sm:$0xff] %v816_v12  ;;  %v565_v21 = vmin.f32 %v500_v5, 0.0  ;;  %v485_v22 = vadd.f32 %v985_v34, %v308_v54  ;;  %v501_v23 = vadd.f32 %v985_v34, %v348_v55  ;;  %v316_v28 = vpop.f32.mrf.mxu0  ;;  %v356_v29 = vpop.f32.mrf.mxu1 }
  0xfb   :  { %v607_v20 = vmul.f32 %v992_v44, %v564_v15  ;;  %v623_v24 = vadd.f32 %v591_v17, %v515_v14  ;;  %v486_v26 = vadd.f32 %v980_v30, %v310_v0  ;;  %v502_v27 = vadd.f32 %v980_v30, %v350_v1 }
  0xfc   :  { %v592_v25 = vmul.f32 %v988_v36, %v549_v19  ;;  %v638_v31 = vadd.f32 %v606_v13, %v530_v8  ;;  %v516_v33 = vmax.f32 %v484_v63, 0.0  ;;  %v550_v35 = vmin.f32 %v485_v22, 0.0  ;;  %v318_v50 = vpop.f32.mrf.mxu0  ;;  %v358_v51 = vpop.f32.mrf.mxu1 }
  0xfd   :  { %v639_v32 = vadd.f32 %v607_v20, %v531_v18  ;;  %v809_v37 = vpack.c.bf16 %v623_v24, %v622_v16  ;;  %v532_v38 = vmax.f32 %v500_v5, 0.0  ;;  %v608_v39 = vmul.f32 %v988_v36, %v565_v21 }
  0xfe   :  { %v566_v40 = vmin.f32 %v501_v23, 0.0  ;;  %v624_v42 = vadd.f32 %v592_v25, %v516_v33  ;;  %v517_v43 = vmax.f32 %v485_v22, 0.0  ;;  %v593_v45 = vmul.f32 %v992_v44, %v550_v35  ;;  %v320_v3 = vpop.f32.mrf.mxu0  ;;  %v360_v4 = vpop.f32.mrf.mxu1 }
  0xff   :  { %v817_v41 = vpack.c.bf16 %v639_v32, %v638_v31  ;;  %747 = vst [vmem:[%s1107_s4 + $0x18] sm:$0xff] %v809_v37  ;;  %v533_v46 = vmax.f32 %v501_v23, 0.0  ;;  %v551_v48 = vmin.f32 %v486_v26, 0.0  ;;  %v567_v49 = vmin.f32 %v502_v27, 0.0 }
 0x100   :  { %v609_v47 = vmul.f32 %v992_v44, %v566_v40  ;;  %v625_v52 = vadd.f32 %v593_v45, %v517_v43  ;;  %v487_v53 = vadd.f32 %v985_v34, %v312_v10  ;;  %v503_v54 = vadd.f32 %v985_v34, %v352_v11  ;;  %v322_v25 = vpop.f32.mrf.mxu0 }
 0x101   :  { %755 = vst [vmem:[%s1107_s4 + $0x58] sm:$0xff] %v817_v41  ;;  %v488_v55 = vadd.f32 %v980_v30, %v316_v28  ;;  %v640_v56 = vadd.f32 %v608_v39, %v532_v38  ;;  %v504_v58 = vadd.f32 %v980_v30, %v356_v29  ;;  %v518_v60 = vmax.f32 %v486_v26, 0.0  ;;  %v362_v26 = vpop.f32.mrf.mxu1 }
 0x102   :  { %v641_v57 = vadd.f32 %v609_v47, %v533_v46  ;;  %v810_v59 = vpack.c.bf16 %v625_v52, %v624_v42  ;;  %v594_v61 = vmul.f32 %v988_v36, %v551_v48  ;;  %v552_v62 = vmin.f32 %v487_v53, 0.0 }
 0x103   :  { %v534_v0 = vmax.f32 %v502_v27, 0.0  ;;  %v610_v1 = vmul.f32 %v988_v36, %v567_v49  ;;  %v568_v2 = vmin.f32 %v503_v54, 0.0  ;;  %v519_v5 = vmax.f32 %v487_v53, 0.0 }
 0x104   :  { %v818_v63 = vpack.c.bf16 %v641_v57, %v640_v56  ;;  %748 = vst [vmem:[%s1107_s4 + $0x20] sm:$0xff] %v810_v59  ;;  %v595_v6 = vmul.f32 %v992_v44, %v552_v62  ;;  %v535_v7 = vmax.f32 %v503_v54, 0.0  ;;  %v553_v8 = vmin.f32 %v488_v55, 0.0 }
 0x105   :  { %v611_v9 = vmul.f32 %v992_v44, %v568_v2  ;;  %v569_v10 = vmin.f32 %v504_v58, 0.0  ;;  %v489_v11 = vadd.f32 %v985_v34, %v318_v50  ;;  %v505_v12 = vadd.f32 %v985_v34, %v358_v51 }
 0x106   :  { %756 = vst [vmem:[%s1107_s4 + $0x60] sm:$0xff] %v818_v63  ;;  %v626_v13 = vadd.f32 %v594_v61, %v518_v60  ;;  %v627_v14 = vadd.f32 %v595_v6, %v519_v5  ;;  %v490_v15 = vadd.f32 %v980_v30, %v320_v3  ;;  %v506_v16 = vadd.f32 %v980_v30, %v360_v4 }
 0x107   :  { %v642_v17 = vadd.f32 %v610_v1, %v534_v0  ;;  %v643_v18 = vadd.f32 %v611_v9, %v535_v7  ;;  %v596_v19 = vmul.f32 %v988_v36, %v553_v8  ;;  %v554_v20 = vmin.f32 %v489_v11, 0.0 }
 0x108   :  { %v811_v21 = vpack.c.bf16 %v627_v14, %v626_v13  ;;  %v520_v22 = vmax.f32 %v488_v55, 0.0  ;;  %v612_v23 = vmul.f32 %v988_v36, %v569_v10  ;;  %v570_v24 = vmin.f32 %v505_v12, 0.0 }
 0x109   :  { %v819_v27 = vpack.c.bf16 %v643_v18, %v642_v17  ;;  %v536_v28 = vmax.f32 %v504_v58, 0.0  ;;  %v521_v29 = vmax.f32 %v489_v11, 0.0  ;;  %v597_v31 = vmul.f32 %v992_v44, %v554_v20 }
 0x10a   :  { %749 = vst [vmem:[%s1107_s4 + $0x28] sm:$0xff] %v811_v21  ;;  %v537_v30 = vmax.f32 %v505_v12, 0.0  ;;  %v613_v32 = vmul.f32 %v992_v44, %v570_v24  ;;  %v555_v33 = vmin.f32 %v490_v15, 0.0  ;;  %v571_v35 = vmin.f32 %v506_v16, 0.0 }
 0x10b   :  { %757 = vst [vmem:[%s1107_s4 + $0x68] sm:$0xff] %v819_v27  ;;  %v628_v37 = vadd.f32 %v596_v19, %v520_v22  ;;  %v629_v38 = vadd.f32 %v597_v31, %v521_v29  ;;  %v491_v39 = vadd.f32 %v985_v34, %v322_v25  ;;  %v507_v40 = vadd.f32 %v985_v34, %v362_v26 }
 0x10c   :  { %v644_v41 = vadd.f32 %v612_v23, %v536_v28  ;;  %v645_v42 = vadd.f32 %v613_v32, %v537_v30  ;;  %v598_v45 = vmul.f32 %v988_v36, %v555_v33  ;;  %v614_v48 = vmul.f32 %v988_v36, %v571_v35 }
 0x10d   :  { %v812_v43 = vpack.c.bf16 %v629_v38, %v628_v37  ;;  %v556_v46 = vmin.f32 %v491_v39, 0.0  ;;  %v572_v49 = vmin.f32 %v507_v40, 0.0  ;;  %v522_v50 = vmax.f32 %v490_v15, 0.0 }
 0x10e   :  { %v820_v47 = vpack.c.bf16 %v645_v42, %v644_v41  ;;  %v523_v51 = vmax.f32 %v491_v39, 0.0  ;;  %v538_v34 = vmax.f32 %v506_v16, 0.0  ;;  %v539_v53 = vmax.f32 %v507_v40, 0.0 }
 0x10f   :  { %750 = vst [vmem:[%s1107_s4 + $0x30] sm:$0xff] %v812_v43  ;;  %v599_v52 = vmul.f32 %v992_v44, %v556_v46  ;;  %v615_v54 = vmul.f32 %v992_v44, %v572_v49  ;;  %v630_v55 = vadd.f32 %v598_v45, %v522_v50 }
 0x110   :  { %758 = vst [vmem:[%s1107_s4 + $0x70] sm:$0xff] %v820_v47  ;;  %v646_v36 = vadd.f32 %v614_v48, %v538_v34 }
 0x111   :  { %v631_v56 = vadd.f32 %v599_v52, %v523_v51  ;;  %v647_v57 = vadd.f32 %v615_v54, %v539_v53 }
 0x113   :  { %v813_v58 = vpack.c.bf16 %v631_v56, %v630_v55  ;;  %v821_v59 = vpack.c.bf16 %v647_v57, %v646_v36 }
 0x115   :  { %751 = vst [vmem:[%s1107_s4 + $0x38] sm:$0xff] %v813_v58  ;;  %759 = vst [vmem:[%s1107_s4 + $0x78] sm:$0xff] %v821_v59 }

</bundles_post_ra>
